<compile_context>
chip_gen: v7x
topology: tpu7x:2x2x1
jax: 0.10.0
libtpu: 0.0.40
codegen_flags: <defaults>
</compile_context>

<pallas_src>
import math
import functools

import jax
import jax.numpy as jnp
import numpy as np
from jax import lax
from jax.experimental import pallas as pl
from jax.experimental.pallas import tpu as pltpu


def attention_kernel(x_bf_ref, xq_ref, mask_ref,
                     wq_ref, bq_ref, wk_ref, bk_ref, wv_ref, bv_ref,
                     wo_ref, bo_ref, gamma_ref, beta_ref,
                     out_ref,
                     k_scr, v_scr, q_scr, acc_scr,
                     *, num_pairs, group, head_dim, q_tile, eps, exp_dtype):
    f32 = jnp.float32
    bf16 = jnp.bfloat16
    gd = group * head_dim
    qt = pl.program_id(1)

    mask = mask_ref[0]                       # (1, S_pad) additive mask, f32

    # ---- K/V projections: two full (S,H)x(H,H) MXU matmuls, once per batch ---
    # element (qt == 0), split into head-pair-major bf16 scratch that stays
    # resident across all query tiles of this batch element.
    @pl.when(qt == 0)
    def _():
        xf = x_bf_ref[0]                                            # (S_pad, H) bf16
        kf = jnp.dot(xf, wk_ref[...], preferred_element_type=f32) + bk_ref[...]
        for p in range(num_pairs):          # static, vreg-aligned lane slices
            k_scr[p] = kf[:, p * gd:(p + 1) * gd].astype(bf16)
        vf = jnp.dot(xf, wv_ref[...], preferred_element_type=f32) + bv_ref[...]
        for p in range(num_pairs):
            v_scr[p] = vf[:, p * gd:(p + 1) * gd].astype(bf16)

    # ---- Q projection: one (TQ,H)x(H,H) matmul per query tile (1/sqrt(d) is --
    # folded into wq/bq by the wrapper), split into head-pair-major scratch so
    # the pair loop below indexes heads along a leading ref axis (free).
    q_start = pl.multiple_of(qt * q_tile, q_tile)
    xq_bf = x_bf_ref[0, pl.ds(q_start, q_tile), :]                  # (TQ, H) bf16
    qf = jnp.dot(xq_bf, wq_ref[...], preferred_element_type=f32) + bq_ref[...]
    for p in range(num_pairs):
        q_scr[p] = qf[:, p * gd:(p + 1) * gd].astype(bf16)

    acc_scr[...] = jnp.zeros_like(acc_scr)

    # ---- Attention core + packed output projection, one head pair per iter. --
    def pair_body(p, carry):
        q_pair = q_scr[p]                                           # (TQ, gd) bf16
        k_pair = k_scr[p]                                           # (S_pad, gd) bf16
        v_pair = v_scr[p]                                           # (S_pad, gd) bf16
        ctxs = []
        for g in range(group):          # two independent EUP/MXU chains per iter
            lo, hi = g * head_dim, (g + 1) * head_dim
            qh = q_pair[:, lo:hi]
            kh = k_pair[:, lo:hi]
            vh = v_pair[:, lo:hi]
            s = lax.dot_general(qh, kh, (((1,), (1,)), ((), ())),
                                preferred_element_type=f32)         # (TQ, S_pad) f32
            s = s + mask
            m = jnp.max(s, axis=-1, keepdims=True)                  # max stays f32
            e = jnp.exp((s - m).astype(exp_dtype))                  # bf16 on v6e/v7x
            l = jnp.sum(e, axis=-1, keepdims=True, dtype=f32)       # row-sum in f32
            inv_l = pl.reciprocal(l, approx=True)
            # TODO(synk): attention_probs dropout omitted (inference / identity).
            ctx = jnp.dot(e.astype(bf16), vh, preferred_element_type=f32)  # (TQ, d)
            # Deferred softmax normalization: scale the (TQ,d) context instead
            # of the (TQ,S) probability slab.
            ctxs.append((ctx * inv_l).astype(bf16))
        ctx_pair = ctxs[0] if group == 1 else jnp.concatenate(ctxs, axis=-1)
        # Output projection per head pair: K = 2*d contraction width.
        acc_scr[...] += jnp.dot(ctx_pair, wo_ref[p], preferred_element_type=f32)
        return carry

    lax.fori_loop(0, num_pairs, pair_body, 0, unroll=num_pairs <= 4)

    # ---- SelfOutput: bias -> (dropout = identity) -> residual -> LayerNorm. --
    x_res = xq_ref[0]                                               # (TQ, H) f32 residual
    y = acc_scr[...] + bo_ref[...] + x_res
    u = jnp.mean(y, axis=-1, keepdims=True)
    var = jnp.mean((y - u) ** 2, axis=-1, keepdims=True)
    y = (y - u) * lax.rsqrt(var + eps)
    y = gamma_ref[...] * y + beta_ref[...]
    out_ref[0] = y.astype(out_ref.dtype)


def attention_forward(x, mask, params, *, num_heads, eps=1e-12, q_tile=256):
    B, S, H = x.shape
    d = H // num_heads
    group = 2 if num_heads % 2 == 0 else 1      # head-pair packing for Wo / scratch
    num_pairs = num_heads // group
    gd = group * d

    f32, bf16 = jnp.float32, jnp.bfloat16

    # ---- Query tile + sequence padding (no TQ = S fallback for odd lengths). -
    if S <= 128:
        TQ = ((S + 7) // 8) * 8
    elif S % 256 == 0 and q_tile >= 256:
        TQ = 256
    else:
        TQ = 128
    S_pad = ((S + TQ - 1) // TQ) * TQ
    pad = S_pad - S

    x_f32 = x.astype(f32)
    if pad:
        x_f32 = jnp.pad(x_f32, ((0, 0), (0, pad), (0, 0)))
    x_bf = x_f32.astype(bf16)        # MXU operand copy; residual/LN stay exact f32

    mask3 = jnp.reshape(mask, (B, 1, S)).astype(f32)
    if pad:
        mask3 = jnp.pad(mask3, ((0, 0), (0, 0), (0, pad)), constant_values=-1e9)

    # ---- Weight layouts (one-time, outside the kernel). ----------------------
    inv_sqrt_d = 1.0 / math.sqrt(d)
    wq2 = (params["wq"].astype(f32) * inv_sqrt_d).astype(bf16)          # (H, H)
    wk2 = params["wk"].astype(bf16)                                     # (H, H)
    wv2 = params["wv"].astype(bf16)                                     # (H, H)
    wo3 = jnp.reshape(params["wo"].astype(bf16), (num_pairs, gd, H))    # pair-major rows
    bq2 = (params["bq"].astype(f32) * inv_sqrt_d).reshape(1, H)
    bk2 = params["bk"].astype(f32).reshape(1, H)
    bv2 = params["bv"].astype(f32).reshape(1, H)
    bo2 = params["bo"].astype(f32).reshape(1, H)
    gamma2 = params["gamma"].astype(f32).reshape(1, H)
    beta2 = params["beta"].astype(f32).reshape(1, H)

    # ---- Chip-aware knobs: bf16 exp only where the EUP supports it; VMEM -----
    # budget below the physical ceiling (v7x has only 64 MiB per TensorCore).
    try:
        kind = jax.devices()[0].device_kind.lower()
    except Exception:
        kind = ""
    older_gen = any(t in kind for t in ("v2", "v3", "v4", "v5"))
    exp_dtype = f32 if older_gen else bf16
    big_vmem = older_gen or ("v6" in kind)
    vmem_limit = (96 if big_vmem else 48) * 1024 * 1024

    kern = functools.partial(attention_kernel,
                             num_pairs=num_pairs, group=group, head_dim=d,
                             q_tile=TQ, eps=eps, exp_dtype=exp_dtype)

    # Grid-invariant parameters: single-buffered (double-buffering them gives no
    # pipelining benefit and just doubles their VMEM footprint).
    wmat_spec = pl.BlockSpec((H, H), lambda b, qt: (0, 0),
                             pipeline_mode=pl.Buffered(1))
    vec_spec = pl.BlockSpec((1, H), lambda b, qt: (0, 0),
                            pipeline_mode=pl.Buffered(1))
    wo_spec = pl.BlockSpec((num_pairs, gd, H), lambda b, qt: (0, 0, 0),
                           pipeline_mode=pl.Buffered(1))

    out = pl.pallas_call(
        kern,
        out_shape=jax.ShapeDtypeStruct((B, S_pad, H), x.dtype),
        grid_spec=pltpu.PrefetchScalarGridSpec(
            num_scalar_prefetch=0,
            grid=(B, S_pad // TQ),
            in_specs=[
                # Full-sequence bf16 hidden states (MXU operand; resident per batch).
                pl.BlockSpec((1, S_pad, H), lambda b, qt: (b, 0, 0)),
                # Per-tile f32 hidden states for the residual / LayerNorm path.
                pl.BlockSpec((1, TQ, H), lambda b, qt: (b, qt, 0)),
                # Additive attention mask (lane-dense (1, S_pad) block).
                pl.BlockSpec((1, 1, S_pad), lambda b, qt: (b, 0, 0)),
                wmat_spec, vec_spec,     # Wq (pre-scaled by 1/sqrt(d)), bq (pre-scaled)
                wmat_spec, vec_spec,     # Wk, bk
                wmat_spec, vec_spec,     # Wv, bv
                wo_spec, vec_spec,       # Wo (head-pair-major rows), bo
                vec_spec, vec_spec,      # gamma, beta
            ],
            out_specs=pl.BlockSpec((1, TQ, H), lambda b, qt: (b, qt, 0)),
            scratch_shapes=[
                pltpu.VMEM((num_pairs, S_pad, gd), bf16),   # K (pair-major, resident)
                pltpu.VMEM((num_pairs, S_pad, gd), bf16),   # V (pair-major, resident)
                pltpu.VMEM((num_pairs, TQ, gd), bf16),      # Q (pair-major, per tile)
                pltpu.VMEM((TQ, H), jnp.float32),           # Wo accumulator
            ],
        ),
        compiler_params=pltpu.CompilerParams(
            # Batch axis feeds megacore; qt is sequential because the K/V
            # scratch filled at qt == 0 is reused by later query tiles.
            # TODO(synk): for v7x with per-chip batch == 1, hoist the K/V
            # projection into its own pallas_call (qt then parallel) and add
            # flash-style K/V chunking when 2*S*H bytes exceed the VMEM budget.
            dimension_semantics=("parallel", "arbitrary"),
            vmem_limit_bytes=vmem_limit,
        ),
    )(x_bf, x_f32, mask3, wq2, bq2, wk2, bk2, wv2, bv2, wo3, bo2, gamma2, beta2)

    return out[:, :S, :]


def reference_forward(x, mask, params, *, num_heads, eps=1e-12):
    """Pure-JAX f32 reference mirroring the PyTorch forward."""
    B, S, H = x.shape
    d = H // num_heads

    def split(t):  # (B,S,H) -> (B,nh,S,d)
        return t.reshape(B, S, num_heads, d).transpose(0, 2, 1, 3)

    q = split(x @ params["wq"] + params["bq"])
    k = split(x @ params["wk"] + params["bk"])
    v = split(x @ params["wv"] + params["bv"])

    scores = jnp.einsum("bnqd,bnkd->bnqk", q, k) / math.sqrt(d)
    scores = scores + mask  # (B,1,1,S) broadcast
    probs = jax.nn.softmax(scores, axis=-1)
    ctx = jnp.einsum("bnqk,bnkd->bnqd", probs, v)
    ctx = ctx.transpose(0, 2, 1, 3).reshape(B, S, H)

    y = ctx @ params["wo"] + params["bo"] + x
    u = jnp.mean(y, axis=-1, keepdims=True)
    s = jnp.mean((y - u) ** 2, axis=-1, keepdims=True)
    y = (y - u) / jnp.sqrt(s + eps)
    return params["gamma"] * y + params["beta"]


if __name__ == "__main__":
    B, S, H, NH = 2, 8, 32, 4

    key = jax.random.PRNGKey(0)
    keys = jax.random.split(key, 8)

    x = jax.random.normal(keys[0], (B, S, H), dtype=jnp.float32)
    # Additive attention mask: 0 for attend, -10000 for masked (BERT style).
    mask_bits = (jax.random.uniform(keys[1], (B, 1, 1, S)) > 0.2).astype(jnp.float32)
    mask = (1.0 - mask_bits) * -10000.0

    def init_linear(k, fan_in, fan_out):
        bound = 1.0 / math.sqrt(fan_in)
        kw, kb = jax.random.split(k)
        w = jax.random.uniform(kw, (fan_in, fan_out), minval=-bound, maxval=bound,
                               dtype=jnp.float32)
        b = jax.random.uniform(kb, (fan_out,), minval=-bound, maxval=bound,
                               dtype=jnp.float32)
        return w, b

    wq, bq = init_linear(keys[2], H, H)
    wk, bk = init_linear(keys[3], H, H)
    wv, bv = init_linear(keys[4], H, H)
    wo, bo = init_linear(keys[5], H, H)

    params = dict(wq=wq, bq=bq, wk=wk, bk=bk, wv=wv, bv=bv, wo=wo, bo=bo,
                  gamma=jnp.ones((H,), jnp.float32),
                  beta=jnp.zeros((H,), jnp.float32))

    out = attention_forward(x, mask, params, num_heads=NH)
    out = jax.block_until_ready(out)

    ref = reference_forward(x, mask, params, num_heads=NH)
    # Tolerance loosened vs. a pure-f32 kernel: matmul operands are bf16
    # (f32 accumulation), the exponent may run in bf16, and the softmax
    # normalization uses an approximate reciprocal.
    np.testing.assert_allclose(np.asarray(out), np.asarray(ref),
                               rtol=5e-2, atol=5e-2)

    print("KERNEL_OK")
</pallas_src>

<mosaic_0001>
module attributes {stable_mosaic.version = 11 : i64} {
  func.func @attention_kernel(%arg0: i32, %arg1: i32, %arg2: memref<1x8x32xbf16, #tpu.memory_space<vmem>>, %arg3: memref<1x8x32xf32, #tpu.memory_space<vmem>>, %arg4: memref<1x1x8xf32, #tpu.memory_space<vmem>>, %arg5: memref<32x32xbf16, #tpu.memory_space<vmem>>, %arg6: memref<1x32xf32, #tpu.memory_space<vmem>>, %arg7: memref<32x32xbf16, #tpu.memory_space<vmem>>, %arg8: memref<1x32xf32, #tpu.memory_space<vmem>>, %arg9: memref<32x32xbf16, #tpu.memory_space<vmem>>, %arg10: memref<1x32xf32, #tpu.memory_space<vmem>>, %arg11: memref<2x16x32xbf16, #tpu.memory_space<vmem>>, %arg12: memref<1x32xf32, #tpu.memory_space<vmem>>, %arg13: memref<1x32xf32, #tpu.memory_space<vmem>>, %arg14: memref<1x32xf32, #tpu.memory_space<vmem>>, %arg15: memref<1x8x32xf32, #tpu.memory_space<vmem>>, %arg16: memref<2x8x16xbf16, #tpu.memory_space<vmem>>, %arg17: memref<2x8x16xbf16, #tpu.memory_space<vmem>>, %arg18: memref<2x8x16xbf16, #tpu.memory_space<vmem>>, %arg19: memref<8x32xf32, #tpu.memory_space<vmem>>) attributes {dimension_semantics = [#tpu.dimension_semantics<parallel>, #tpu.dimension_semantics<arbitrary>], iteration_bounds = array<i64: 2, 1>, scalar_prefetch = 0 : i64, scratch_operands = 4 : i64, tpu.core_type = #tpu.core_type<tc>, window_params = [{transform_indices = @transform_0, window_bounds = array<i64: 1, 8, 32>}, {transform_indices = @transform_1, window_bounds = array<i64: 1, 8, 32>}, {transform_indices = @transform_2, window_bounds = array<i64: 1, 1, 8>}, {pipeline_mode = #tpu.pipeline_mode<synchronous>, transform_indices = @transform_3, window_bounds = array<i64: 32, 32>}, {pipeline_mode = #tpu.pipeline_mode<synchronous>, transform_indices = @transform_4, window_bounds = array<i64: 1, 32>}, {pipeline_mode = #tpu.pipeline_mode<synchronous>, transform_indices = @transform_5, window_bounds = array<i64: 32, 32>}, {pipeline_mode = #tpu.pipeline_mode<synchronous>, transform_indices = @transform_6, window_bounds = array<i64: 1, 32>}, {pipeline_mode = #tpu.pipeline_mode<synchronous>, transform_indices = @transform_7, window_bounds = array<i64: 32, 32>}, {pipeline_mode = #tpu.pipeline_mode<synchronous>, transform_indices = @transform_8, window_bounds = array<i64: 1, 32>}, {pipeline_mode = #tpu.pipeline_mode<synchronous>, transform_indices = @transform_9, window_bounds = array<i64: 2, 16, 32>}, {pipeline_mode = #tpu.pipeline_mode<synchronous>, transform_indices = @transform_10, window_bounds = array<i64: 1, 32>}, {pipeline_mode = #tpu.pipeline_mode<synchronous>, transform_indices = @transform_11, window_bounds = array<i64: 1, 32>}, {pipeline_mode = #tpu.pipeline_mode<synchronous>, transform_indices = @transform_12, window_bounds = array<i64: 1, 32>}, {transform_indices = @transform_13, window_bounds = array<i64: 1, 8, 32>}]} {
    %c0 = arith.constant 0 : index
    %c0_0 = arith.constant 0 : index
    %c0_1 = arith.constant 0 : index
    %0 = vector.load %arg4[%c0, %c0_0, %c0_1] : memref<1x1x8xf32, #tpu.memory_space<vmem>>, vector<1x1x8xf32>
    %1 = vector.shape_cast %0 : vector<1x1x8xf32> to vector<1x8xf32>
    %c0_i32 = arith.constant 0 : i32
    %2 = arith.cmpi eq, %arg1, %c0_i32 : i32
    %3 = arith.extui %2 : i1 to i32
    %c0_i32_2 = arith.constant 0 : i32
    %4 = arith.cmpi ne, %3, %c0_i32_2 : i32
    scf.if %4 {
      %c0_79 = arith.constant 0 : index
      %c0_80 = arith.constant 0 : index
      %c0_81 = arith.constant 0 : index
      %175 = vector.load %arg2[%c0_79, %c0_80, %c0_81] : memref<1x8x32xbf16, #tpu.memory_space<vmem>>, vector<1x8x32xbf16>
      %176 = vector.shape_cast %175 : vector<1x8x32xbf16> to vector<8x32xbf16>
      %c0_82 = arith.constant 0 : index
      %c0_83 = arith.constant 0 : index
      %177 = vector.load %arg7[%c0_82, %c0_83] : memref<32x32xbf16, #tpu.memory_space<vmem>>, vector<32x32xbf16>
      %cst_84 = arith.constant dense<0.000000e+00> : vector<8x32xf32>
      %178 = tpu.matmul %176, %177, %cst_84 {dimension_numbers = #tpu.dot_dimension_numbers<[1], [0], [0], [1], [0, 0, 1, 1], [], []>} : vector<8x32xbf16>, vector<32x32xbf16>, vector<8x32xf32> -> vector<8x32xf32>
      %c0_85 = arith.constant 0 : index
      %c0_86 = arith.constant 0 : index
      %179 = vector.load %arg8[%c0_85, %c0_86] : memref<1x32xf32, #tpu.memory_space<vmem>>, vector<1x32xf32>
      %180 = vector.broadcast %179 : vector<1x32xf32> to vector<8x32xf32>
      %181 = arith.addf %178, %180 : vector<8x32xf32>
      %182 = vector.extract_strided_slice %181 {offsets = [0, 0], sizes = [8, 16], strides = [1, 1]} : vector<8x32xf32> to vector<8x16xf32>
      %183 = arith.truncf %182 : vector<8x16xf32> to vector<8x16xbf16>
      %c0_87 = arith.constant 0 : index
      %c0_88 = arith.constant 0 : index
      %c0_89 = arith.constant 0 : index
      %184 = vector.load %arg16[%c0_87, %c0_88, %c0_89] : memref<2x8x16xbf16, #tpu.memory_space<vmem>>, vector<1x8x16xbf16>
      %185 = vector.shape_cast %184 : vector<1x8x16xbf16> to vector<8x16xbf16>
      %186 = vector.shape_cast %183 : vector<8x16xbf16> to vector<1x8x16xbf16>
      tpu.vector_store %arg16[%c0_87, %c0_88, %c0_89], %186 {strides = array<i32>} : memref<2x8x16xbf16, #tpu.memory_space<vmem>>, vector<1x8x16xbf16>,
      %187 = vector.extract_strided_slice %181 {offsets = [0, 16], sizes = [8, 16], strides = [1, 1]} : vector<8x32xf32> to vector<8x16xf32>
      %188 = arith.truncf %187 : vector<8x16xf32> to vector<8x16xbf16>
      %c1_90 = arith.constant 1 : index
      %c0_91 = arith.constant 0 : index
      %c0_92 = arith.constant 0 : index
      %189 = vector.load %arg16[%c1_90, %c0_91, %c0_92] : memref<2x8x16xbf16, #tpu.memory_space<vmem>>, vector<1x8x16xbf16>
      %190 = vector.shape_cast %189 : vector<1x8x16xbf16> to vector<8x16xbf16>
      %191 = vector.shape_cast %188 : vector<8x16xbf16> to vector<1x8x16xbf16>
      tpu.vector_store %arg16[%c1_90, %c0_91, %c0_92], %191 {strides = array<i32>} : memref<2x8x16xbf16, #tpu.memory_space<vmem>>, vector<1x8x16xbf16>,
      %c0_93 = arith.constant 0 : index
      %c0_94 = arith.constant 0 : index
      %192 = vector.load %arg9[%c0_93, %c0_94] : memref<32x32xbf16, #tpu.memory_space<vmem>>, vector<32x32xbf16>
      %cst_95 = arith.constant dense<0.000000e+00> : vector<8x32xf32>
      %193 = tpu.matmul %176, %192, %cst_95 {dimension_numbers = #tpu.dot_dimension_numbers<[1], [0], [0], [1], [0, 0, 1, 1], [], []>} : vector<8x32xbf16>, vector<32x32xbf16>, vector<8x32xf32> -> vector<8x32xf32>
      %c0_96 = arith.constant 0 : index
      %c0_97 = arith.constant 0 : index
      %194 = vector.load %arg10[%c0_96, %c0_97] : memref<1x32xf32, #tpu.memory_space<vmem>>, vector<1x32xf32>
      %195 = vector.broadcast %194 : vector<1x32xf32> to vector<8x32xf32>
      %196 = arith.addf %193, %195 : vector<8x32xf32>
      %197 = vector.extract_strided_slice %196 {offsets = [0, 0], sizes = [8, 16], strides = [1, 1]} : vector<8x32xf32> to vector<8x16xf32>
      %198 = arith.truncf %197 : vector<8x16xf32> to vector<8x16xbf16>
      %c0_98 = arith.constant 0 : index
      %c0_99 = arith.constant 0 : index
      %c0_100 = arith.constant 0 : index
      %199 = vector.load %arg17[%c0_98, %c0_99, %c0_100] : memref<2x8x16xbf16, #tpu.memory_space<vmem>>, vector<1x8x16xbf16>
      %200 = vector.shape_cast %199 : vector<1x8x16xbf16> to vector<8x16xbf16>
      %201 = vector.shape_cast %198 : vector<8x16xbf16> to vector<1x8x16xbf16>
      tpu.vector_store %arg17[%c0_98, %c0_99, %c0_100], %201 {strides = array<i32>} : memref<2x8x16xbf16, #tpu.memory_space<vmem>>, vector<1x8x16xbf16>,
      %202 = vector.extract_strided_slice %196 {offsets = [0, 16], sizes = [8, 16], strides = [1, 1]} : vector<8x32xf32> to vector<8x16xf32>
      %203 = arith.truncf %202 : vector<8x16xf32> to vector<8x16xbf16>
      %c1_101 = arith.constant 1 : index
      %c0_102 = arith.constant 0 : index
      %c0_103 = arith.constant 0 : index
      %204 = vector.load %arg17[%c1_101, %c0_102, %c0_103] : memref<2x8x16xbf16, #tpu.memory_space<vmem>>, vector<1x8x16xbf16>
      %205 = vector.shape_cast %204 : vector<1x8x16xbf16> to vector<8x16xbf16>
      %206 = vector.shape_cast %203 : vector<8x16xbf16> to vector<1x8x16xbf16>
      tpu.vector_store %arg17[%c1_101, %c0_102, %c0_103], %206 {strides = array<i32>} : memref<2x8x16xbf16, #tpu.memory_space<vmem>>, vector<1x8x16xbf16>,
    } else {
    }
    %c8_i32 = arith.constant 8 : i32
    %5 = arith.muli %arg1, %c8_i32 : i32
    %6 = tpu.assume_multiple %5, 8 : i32
    %c0_3 = arith.constant 0 : index
    %7 = arith.index_cast %6 : i32 to index
    %c0_4 = arith.constant 0 : index
    %8 = vector.load %arg2[%c0_3, %7, %c0_4] : memref<1x8x32xbf16, #tpu.memory_space<vmem>>, vector<1x8x32xbf16>
    %9 = vector.shape_cast %8 : vector<1x8x32xbf16> to vector<8x32xbf16>
    %c0_5 = arith.constant 0 : index
    %c0_6 = arith.constant 0 : index
    %10 = vector.load %arg5[%c0_5, %c0_6] : memref<32x32xbf16, #tpu.memory_space<vmem>>, vector<32x32xbf16>
    %cst = arith.constant dense<0.000000e+00> : vector<8x32xf32>
    %11 = tpu.matmul %9, %10, %cst {dimension_numbers = #tpu.dot_dimension_numbers<[1], [0], [0], [1], [0, 0, 1, 1], [], []>} : vector<8x32xbf16>, vector<32x32xbf16>, vector<8x32xf32> -> vector<8x32xf32>
    %c0_7 = arith.constant 0 : index
    %c0_8 = arith.constant 0 : index
    %12 = vector.load %arg6[%c0_7, %c0_8] : memref<1x32xf32, #tpu.memory_space<vmem>>, vector<1x32xf32>
    %13 = vector.broadcast %12 : vector<1x32xf32> to vector<8x32xf32>
    %14 = arith.addf %11, %13 : vector<8x32xf32>
    %15 = vector.extract_strided_slice %14 {offsets = [0, 0], sizes = [8, 16], strides = [1, 1]} : vector<8x32xf32> to vector<8x16xf32>
    %16 = arith.truncf %15 : vector<8x16xf32> to vector<8x16xbf16>
    %c0_9 = arith.constant 0 : index
    %c0_10 = arith.constant 0 : index
    %c0_11 = arith.constant 0 : index
    %17 = vector.load %arg18[%c0_9, %c0_10, %c0_11] : memref<2x8x16xbf16, #tpu.memory_space<vmem>>, vector<1x8x16xbf16>
    %18 = vector.shape_cast %17 : vector<1x8x16xbf16> to vector<8x16xbf16>
    %19 = vector.shape_cast %16 : vector<8x16xbf16> to vector<1x8x16xbf16>
    tpu.vector_store %arg18[%c0_9, %c0_10, %c0_11], %19 {strides = array<i32>} : memref<2x8x16xbf16, #tpu.memory_space<vmem>>, vector<1x8x16xbf16>,
    %20 = vector.extract_strided_slice %14 {offsets = [0, 16], sizes = [8, 16], strides = [1, 1]} : vector<8x32xf32> to vector<8x16xf32>
    %21 = arith.truncf %20 : vector<8x16xf32> to vector<8x16xbf16>
    %c1 = arith.constant 1 : index
    %c0_12 = arith.constant 0 : index
    %c0_13 = arith.constant 0 : index
    %22 = vector.load %arg18[%c1, %c0_12, %c0_13] : memref<2x8x16xbf16, #tpu.memory_space<vmem>>, vector<1x8x16xbf16>
    %23 = vector.shape_cast %22 : vector<1x8x16xbf16> to vector<8x16xbf16>
    %24 = vector.shape_cast %21 : vector<8x16xbf16> to vector<1x8x16xbf16>
    tpu.vector_store %arg18[%c1, %c0_12, %c0_13], %24 {strides = array<i32>} : memref<2x8x16xbf16, #tpu.memory_space<vmem>>, vector<1x8x16xbf16>,
    %cst_14 = arith.constant 0.000000e+00 : f32
    %25 = vector.broadcast %cst_14 : f32 to vector<8x32xf32>
    %c0_15 = arith.constant 0 : index
    %c0_16 = arith.constant 0 : index
    %26 = vector.load %arg19[%c0_15, %c0_16] : memref<8x32xf32, #tpu.memory_space<vmem>>, vector<8x32xf32>
    tpu.vector_store %arg19[%c0_15, %c0_16], %25 {strides = array<i32>} : memref<8x32xf32, #tpu.memory_space<vmem>>, vector<8x32xf32>,
    %c0_i32_17 = arith.constant 0 : i32
    %27 = arith.index_cast %c0_i32_17 : i32 to index
    %c0_18 = arith.constant 0 : index
    %c0_19 = arith.constant 0 : index
    %28 = vector.load %arg18[%27, %c0_18, %c0_19] : memref<2x8x16xbf16, #tpu.memory_space<vmem>>, vector<1x8x16xbf16>
    %29 = vector.shape_cast %28 : vector<1x8x16xbf16> to vector<8x16xbf16>
    %30 = arith.index_cast %c0_i32_17 : i32 to index
    %c0_20 = arith.constant 0 : index
    %c0_21 = arith.constant 0 : index
    %31 = vector.load %arg16[%30, %c0_20, %c0_21] : memref<2x8x16xbf16, #tpu.memory_space<vmem>>, vector<1x8x16xbf16>
    %32 = vector.shape_cast %31 : vector<1x8x16xbf16> to vector<8x16xbf16>
    %33 = arith.index_cast %c0_i32_17 : i32 to index
    %c0_22 = arith.constant 0 : index
    %c0_23 = arith.constant 0 : index
    %34 = vector.load %arg17[%33, %c0_22, %c0_23] : memref<2x8x16xbf16, #tpu.memory_space<vmem>>, vector<1x8x16xbf16>
    %35 = vector.shape_cast %34 : vector<1x8x16xbf16> to vector<8x16xbf16>
    %36 = vector.extract_strided_slice %29 {offsets = [0, 0], sizes = [8, 8], strides = [1, 1]} : vector<8x16xbf16> to vector<8x8xbf16>
    %37 = vector.extract_strided_slice %32 {offsets = [0, 0], sizes = [8, 8], strides = [1, 1]} : vector<8x16xbf16> to vector<8x8xbf16>
    %38 = vector.extract_strided_slice %35 {offsets = [0, 0], sizes = [8, 8], strides = [1, 1]} : vector<8x16xbf16> to vector<8x8xbf16>
    %cst_24 = arith.constant dense<0.000000e+00> : vector<8x8xf32>
    %39 = tpu.matmul %36, %37, %cst_24 {dimension_numbers = #tpu.dot_dimension_numbers<[1], [1], [0], [0], [0, 0, 1, 0], [], []>} : vector<8x8xbf16>, vector<8x8xbf16>, vector<8x8xf32> -> vector<8x8xf32>
    %40 = vector.broadcast %1 : vector<1x8xf32> to vector<8x8xf32>
    %41 = arith.addf %39, %40 : vector<8x8xf32>
    %cst_25 = arith.constant dense<0xFF800000> : vector<8xf32>
    %42 = vector.multi_reduction <maximumf>, %41, %cst_25 [1] : vector<8x8xf32> to vector<8xf32>
    %43 = vector.shape_cast %42 : vector<8xf32> to vector<8x1xf32>
    %44 = vector.broadcast %43 : vector<8x1xf32> to vector<8x8xf32>
    %45 = arith.subf %41, %44 : vector<8x8xf32>
    %46 = arith.truncf %45 : vector<8x8xf32> to vector<8x8xbf16>
    %47 = math.exp %46 : vector<8x8xbf16>
    %48 = arith.extf %47 : vector<8x8xbf16> to vector<8x8xf32>
    %cst_26 = arith.constant dense<0.000000e+00> : vector<8xf32>
    %49 = vector.multi_reduction <add>, %48, %cst_26 [1] : vector<8x8xf32> to vector<8xf32>
    %50 = vector.shape_cast %49 : vector<8xf32> to vector<8x1xf32>
    %51 = tpu.reciprocal %50 {approx = true} : vector<8x1xf32> -> vector<8x1xf32>
    %cst_27 = arith.constant dense<0.000000e+00> : vector<8x8xf32>
    %52 = tpu.matmul %47, %38, %cst_27 {dimension_numbers = #tpu.dot_dimension_numbers<[1], [0], [0], [1], [0, 0, 1, 1], [], []>} : vector<8x8xbf16>, vector<8x8xbf16>, vector<8x8xf32> -> vector<8x8xf32>
    %53 = vector.broadcast %51 : vector<8x1xf32> to vector<8x8xf32>
    %54 = arith.mulf %52, %53 : vector<8x8xf32>
    %55 = arith.truncf %54 : vector<8x8xf32> to vector<8x8xbf16>
    %56 = vector.extract_strided_slice %29 {offsets = [0, 8], sizes = [8, 8], strides = [1, 1]} : vector<8x16xbf16> to vector<8x8xbf16>
    %57 = vector.extract_strided_slice %32 {offsets = [0, 8], sizes = [8, 8], strides = [1, 1]} : vector<8x16xbf16> to vector<8x8xbf16>
    %58 = vector.extract_strided_slice %35 {offsets = [0, 8], sizes = [8, 8], strides = [1, 1]} : vector<8x16xbf16> to vector<8x8xbf16>
    %cst_28 = arith.constant dense<0.000000e+00> : vector<8x8xf32>
    %59 = tpu.matmul %56, %57, %cst_28 {dimension_numbers = #tpu.dot_dimension_numbers<[1], [1], [0], [0], [0, 0, 1, 0], [], []>} : vector<8x8xbf16>, vector<8x8xbf16>, vector<8x8xf32> -> vector<8x8xf32>
    %60 = vector.broadcast %1 : vector<1x8xf32> to vector<8x8xf32>
    %61 = arith.addf %59, %60 : vector<8x8xf32>
    %cst_29 = arith.constant dense<0xFF800000> : vector<8xf32>
    %62 = vector.multi_reduction <maximumf>, %61, %cst_29 [1] : vector<8x8xf32> to vector<8xf32>
    %63 = vector.shape_cast %62 : vector<8xf32> to vector<8x1xf32>
    %64 = vector.broadcast %63 : vector<8x1xf32> to vector<8x8xf32>
    %65 = arith.subf %61, %64 : vector<8x8xf32>
    %66 = arith.truncf %65 : vector<8x8xf32> to vector<8x8xbf16>
    %67 = math.exp %66 : vector<8x8xbf16>
    %68 = arith.extf %67 : vector<8x8xbf16> to vector<8x8xf32>
    %cst_30 = arith.constant dense<0.000000e+00> : vector<8xf32>
    %69 = vector.multi_reduction <add>, %68, %cst_30 [1] : vector<8x8xf32> to vector<8xf32>
    %70 = vector.shape_cast %69 : vector<8xf32> to vector<8x1xf32>
    %71 = tpu.reciprocal %70 {approx = true} : vector<8x1xf32> -> vector<8x1xf32>
    %cst_31 = arith.constant dense<0.000000e+00> : vector<8x8xf32>
    %72 = tpu.matmul %67, %58, %cst_31 {dimension_numbers = #tpu.dot_dimension_numbers<[1], [0], [0], [1], [0, 0, 1, 1], [], []>} : vector<8x8xbf16>, vector<8x8xbf16>, vector<8x8xf32> -> vector<8x8xf32>
    %73 = vector.broadcast %71 : vector<8x1xf32> to vector<8x8xf32>
    %74 = arith.mulf %72, %73 : vector<8x8xf32>
    %75 = arith.truncf %74 : vector<8x8xf32> to vector<8x8xbf16>
    %76 = tpu.concatenate %55, %75 in 1 : vector<8x8xbf16>, vector<8x8xbf16> -> vector<8x16xbf16>
    %c0_32 = arith.constant 0 : index
    %c0_33 = arith.constant 0 : index
    %77 = vector.load %arg19[%c0_32, %c0_33] : memref<8x32xf32, #tpu.memory_space<vmem>>, vector<8x32xf32>
    %78 = arith.index_cast %c0_i32_17 : i32 to index
    %c0_34 = arith.constant 0 : index
    %c0_35 = arith.constant 0 : index
    %79 = vector.load %arg11[%78, %c0_34, %c0_35] : memref<2x16x32xbf16, #tpu.memory_space<vmem>>, vector<1x16x32xbf16>
    %80 = vector.shape_cast %79 : vector<1x16x32xbf16> to vector<16x32xbf16>
    %cst_36 = arith.constant dense<0.000000e+00> : vector<8x32xf32>
    %81 = tpu.matmul %76, %80, %cst_36 {dimension_numbers = #tpu.dot_dimension_numbers<[1], [0], [0], [1], [0, 0, 1, 1], [], []>} : vector<8x16xbf16>, vector<16x32xbf16>, vector<8x32xf32> -> vector<8x32xf32>
    %82 = arith.addf %77, %81 : vector<8x32xf32>
    %c0_37 = arith.constant 0 : index
    %c0_38 = arith.constant 0 : index
    %83 = vector.load %arg19[%c0_37, %c0_38] : memref<8x32xf32, #tpu.memory_space<vmem>>, vector<8x32xf32>
    tpu.vector_store %arg19[%c0_37, %c0_38], %82 {strides = array<i32>} : memref<8x32xf32, #tpu.memory_space<vmem>>, vector<8x32xf32>,
    %c1_i32 = arith.constant 1 : i32
    %84 = arith.index_cast %c1_i32 : i32 to index
    %c0_39 = arith.constant 0 : index
    %c0_40 = arith.constant 0 : index
    %85 = vector.load %arg18[%84, %c0_39, %c0_40] : memref<2x8x16xbf16, #tpu.memory_space<vmem>>, vector<1x8x16xbf16>
    %86 = vector.shape_cast %85 : vector<1x8x16xbf16> to vector<8x16xbf16>
    %87 = arith.index_cast %c1_i32 : i32 to index
    %c0_41 = arith.constant 0 : index
    %c0_42 = arith.constant 0 : index
    %88 = vector.load %arg16[%87, %c0_41, %c0_42] : memref<2x8x16xbf16, #tpu.memory_space<vmem>>, vector<1x8x16xbf16>
    %89 = vector.shape_cast %88 : vector<1x8x16xbf16> to vector<8x16xbf16>
    %90 = arith.index_cast %c1_i32 : i32 to index
    %c0_43 = arith.constant 0 : index
    %c0_44 = arith.constant 0 : index
    %91 = vector.load %arg17[%90, %c0_43, %c0_44] : memref<2x8x16xbf16, #tpu.memory_space<vmem>>, vector<1x8x16xbf16>
    %92 = vector.shape_cast %91 : vector<1x8x16xbf16> to vector<8x16xbf16>
    %93 = vector.extract_strided_slice %86 {offsets = [0, 0], sizes = [8, 8], strides = [1, 1]} : vector<8x16xbf16> to vector<8x8xbf16>
    %94 = vector.extract_strided_slice %89 {offsets = [0, 0], sizes = [8, 8], strides = [1, 1]} : vector<8x16xbf16> to vector<8x8xbf16>
    %95 = vector.extract_strided_slice %92 {offsets = [0, 0], sizes = [8, 8], strides = [1, 1]} : vector<8x16xbf16> to vector<8x8xbf16>
    %cst_45 = arith.constant dense<0.000000e+00> : vector<8x8xf32>
    %96 = tpu.matmul %93, %94, %cst_45 {dimension_numbers = #tpu.dot_dimension_numbers<[1], [1], [0], [0], [0, 0, 1, 0], [], []>} : vector<8x8xbf16>, vector<8x8xbf16>, vector<8x8xf32> -> vector<8x8xf32>
    %97 = vector.broadcast %1 : vector<1x8xf32> to vector<8x8xf32>
    %98 = arith.addf %96, %97 : vector<8x8xf32>
    %cst_46 = arith.constant dense<0xFF800000> : vector<8xf32>
    %99 = vector.multi_reduction <maximumf>, %98, %cst_46 [1] : vector<8x8xf32> to vector<8xf32>
    %100 = vector.shape_cast %99 : vector<8xf32> to vector<8x1xf32>
    %101 = vector.broadcast %100 : vector<8x1xf32> to vector<8x8xf32>
    %102 = arith.subf %98, %101 : vector<8x8xf32>
    %103 = arith.truncf %102 : vector<8x8xf32> to vector<8x8xbf16>
    %104 = math.exp %103 : vector<8x8xbf16>
    %105 = arith.extf %104 : vector<8x8xbf16> to vector<8x8xf32>
    %cst_47 = arith.constant dense<0.000000e+00> : vector<8xf32>
    %106 = vector.multi_reduction <add>, %105, %cst_47 [1] : vector<8x8xf32> to vector<8xf32>
    %107 = vector.shape_cast %106 : vector<8xf32> to vector<8x1xf32>
    %108 = tpu.reciprocal %107 {approx = true} : vector<8x1xf32> -> vector<8x1xf32>
    %cst_48 = arith.constant dense<0.000000e+00> : vector<8x8xf32>
    %109 = tpu.matmul %104, %95, %cst_48 {dimension_numbers = #tpu.dot_dimension_numbers<[1], [0], [0], [1], [0, 0, 1, 1], [], []>} : vector<8x8xbf16>, vector<8x8xbf16>, vector<8x8xf32> -> vector<8x8xf32>
    %110 = vector.broadcast %108 : vector<8x1xf32> to vector<8x8xf32>
    %111 = arith.mulf %109, %110 : vector<8x8xf32>
    %112 = arith.truncf %111 : vector<8x8xf32> to vector<8x8xbf16>
    %113 = vector.extract_strided_slice %86 {offsets = [0, 8], sizes = [8, 8], strides = [1, 1]} : vector<8x16xbf16> to vector<8x8xbf16>
    %114 = vector.extract_strided_slice %89 {offsets = [0, 8], sizes = [8, 8], strides = [1, 1]} : vector<8x16xbf16> to vector<8x8xbf16>
    %115 = vector.extract_strided_slice %92 {offsets = [0, 8], sizes = [8, 8], strides = [1, 1]} : vector<8x16xbf16> to vector<8x8xbf16>
    %cst_49 = arith.constant dense<0.000000e+00> : vector<8x8xf32>
    %116 = tpu.matmul %113, %114, %cst_49 {dimension_numbers = #tpu.dot_dimension_numbers<[1], [1], [0], [0], [0, 0, 1, 0], [], []>} : vector<8x8xbf16>, vector<8x8xbf16>, vector<8x8xf32> -> vector<8x8xf32>
    %117 = vector.broadcast %1 : vector<1x8xf32> to vector<8x8xf32>
    %118 = arith.addf %116, %117 : vector<8x8xf32>
    %cst_50 = arith.constant dense<0xFF800000> : vector<8xf32>
    %119 = vector.multi_reduction <maximumf>, %118, %cst_50 [1] : vector<8x8xf32> to vector<8xf32>
    %120 = vector.shape_cast %119 : vector<8xf32> to vector<8x1xf32>
    %121 = vector.broadcast %120 : vector<8x1xf32> to vector<8x8xf32>
    %122 = arith.subf %118, %121 : vector<8x8xf32>
    %123 = arith.truncf %122 : vector<8x8xf32> to vector<8x8xbf16>
    %124 = math.exp %123 : vector<8x8xbf16>
    %125 = arith.extf %124 : vector<8x8xbf16> to vector<8x8xf32>
    %cst_51 = arith.constant dense<0.000000e+00> : vector<8xf32>
    %126 = vector.multi_reduction <add>, %125, %cst_51 [1] : vector<8x8xf32> to vector<8xf32>
    %127 = vector.shape_cast %126 : vector<8xf32> to vector<8x1xf32>
    %128 = tpu.reciprocal %127 {approx = true} : vector<8x1xf32> -> vector<8x1xf32>
    %cst_52 = arith.constant dense<0.000000e+00> : vector<8x8xf32>
    %129 = tpu.matmul %124, %115, %cst_52 {dimension_numbers = #tpu.dot_dimension_numbers<[1], [0], [0], [1], [0, 0, 1, 1], [], []>} : vector<8x8xbf16>, vector<8x8xbf16>, vector<8x8xf32> -> vector<8x8xf32>
    %130 = vector.broadcast %128 : vector<8x1xf32> to vector<8x8xf32>
    %131 = arith.mulf %129, %130 : vector<8x8xf32>
    %132 = arith.truncf %131 : vector<8x8xf32> to vector<8x8xbf16>
    %133 = tpu.concatenate %112, %132 in 1 : vector<8x8xbf16>, vector<8x8xbf16> -> vector<8x16xbf16>
    %c0_53 = arith.constant 0 : index
    %c0_54 = arith.constant 0 : index
    %134 = vector.load %arg19[%c0_53, %c0_54] : memref<8x32xf32, #tpu.memory_space<vmem>>, vector<8x32xf32>
    %135 = arith.index_cast %c1_i32 : i32 to index
    %c0_55 = arith.constant 0 : index
    %c0_56 = arith.constant 0 : index
    %136 = vector.load %arg11[%135, %c0_55, %c0_56] : memref<2x16x32xbf16, #tpu.memory_space<vmem>>, vector<1x16x32xbf16>
    %137 = vector.shape_cast %136 : vector<1x16x32xbf16> to vector<16x32xbf16>
    %cst_57 = arith.constant dense<0.000000e+00> : vector<8x32xf32>
    %138 = tpu.matmul %133, %137, %cst_57 {dimension_numbers = #tpu.dot_dimension_numbers<[1], [0], [0], [1], [0, 0, 1, 1], [], []>} : vector<8x16xbf16>, vector<16x32xbf16>, vector<8x32xf32> -> vector<8x32xf32>
    %139 = arith.addf %134, %138 : vector<8x32xf32>
    %c0_58 = arith.constant 0 : index
    %c0_59 = arith.constant 0 : index
    %140 = vector.load %arg19[%c0_58, %c0_59] : memref<8x32xf32, #tpu.memory_space<vmem>>, vector<8x32xf32>
    tpu.vector_store %arg19[%c0_58, %c0_59], %139 {strides = array<i32>} : memref<8x32xf32, #tpu.memory_space<vmem>>, vector<8x32xf32>,
    %c2_i32 = arith.constant 2 : i32
    %c0_60 = arith.constant 0 : index
    %c0_61 = arith.constant 0 : index
    %c0_62 = arith.constant 0 : index
    %141 = vector.load %arg3[%c0_60, %c0_61, %c0_62] : memref<1x8x32xf32, #tpu.memory_space<vmem>>, vector<1x8x32xf32>
    %142 = vector.shape_cast %141 : vector<1x8x32xf32> to vector<8x32xf32>
    %c0_63 = arith.constant 0 : index
    %c0_64 = arith.constant 0 : index
    %143 = vector.load %arg19[%c0_63, %c0_64] : memref<8x32xf32, #tpu.memory_space<vmem>>, vector<8x32xf32>
    %c0_65 = arith.constant 0 : index
    %c0_66 = arith.constant 0 : index
    %144 = vector.load %arg12[%c0_65, %c0_66] : memref<1x32xf32, #tpu.memory_space<vmem>>, vector<1x32xf32>
    %145 = vector.broadcast %144 : vector<1x32xf32> to vector<8x32xf32>
    %146 = arith.addf %143, %145 : vector<8x32xf32>
    %147 = arith.addf %146, %142 : vector<8x32xf32>
    %cst_67 = arith.constant dense<0.000000e+00> : vector<8xf32>
    %148 = vector.multi_reduction <add>, %147, %cst_67 [1] : vector<8x32xf32> to vector<8xf32>
    %149 = vector.shape_cast %148 : vector<8xf32> to vector<8x1xf32>
    %cst_68 = arith.constant 3.200000e+01 : f32
    %150 = vector.broadcast %cst_68 : f32 to vector<8x1xf32>
    %151 = arith.divf %149, %150 : vector<8x1xf32>
    %152 = vector.broadcast %151 : vector<8x1xf32> to vector<8x32xf32>
    %153 = arith.subf %147, %152 : vector<8x32xf32>
    %154 = arith.mulf %153, %153 : vector<8x32xf32>
    %cst_69 = arith.constant dense<0.000000e+00> : vector<8xf32>
    %155 = vector.multi_reduction <add>, %154, %cst_69 [1] : vector<8x32xf32> to vector<8xf32>
    %156 = vector.shape_cast %155 : vector<8xf32> to vector<8x1xf32>
    %cst_70 = arith.constant 3.200000e+01 : f32
    %157 = vector.broadcast %cst_70 : f32 to vector<8x1xf32>
    %158 = arith.divf %156, %157 : vector<8x1xf32>
    %159 = vector.broadcast %151 : vector<8x1xf32> to vector<8x32xf32>
    %160 = arith.subf %147, %159 : vector<8x32xf32>
    %cst_71 = arith.constant 9.99999996E-13 : f32
    %161 = vector.broadcast %cst_71 : f32 to vector<8x1xf32>
    %162 = arith.addf %158, %161 : vector<8x1xf32>
    %163 = math.rsqrt %162 : vector<8x1xf32>
    %164 = vector.broadcast %163 : vector<8x1xf32> to vector<8x32xf32>
    %165 = arith.mulf %160, %164 : vector<8x32xf32>
    %c0_72 = arith.constant 0 : index
    %c0_73 = arith.constant 0 : index
    %166 = vector.load %arg13[%c0_72, %c0_73] : memref<1x32xf32, #tpu.memory_space<vmem>>, vector<1x32xf32>
    %167 = vector.broadcast %166 : vector<1x32xf32> to vector<8x32xf32>
    %168 = arith.mulf %167, %165 : vector<8x32xf32>
    %c0_74 = arith.constant 0 : index
    %c0_75 = arith.constant 0 : index
    %169 = vector.load %arg14[%c0_74, %c0_75] : memref<1x32xf32, #tpu.memory_space<vmem>>, vector<1x32xf32>
    %170 = vector.broadcast %169 : vector<1x32xf32> to vector<8x32xf32>
    %171 = arith.addf %168, %170 : vector<8x32xf32>
    %c0_76 = arith.constant 0 : index
    %c0_77 = arith.constant 0 : index
    %c0_78 = arith.constant 0 : index
    %172 = vector.load %arg15[%c0_76, %c0_77, %c0_78] : memref<1x8x32xf32, #tpu.memory_space<vmem>>, vector<1x8x32xf32>
    %173 = vector.shape_cast %172 : vector<1x8x32xf32> to vector<8x32xf32>
    %174 = vector.shape_cast %171 : vector<8x32xf32> to vector<1x8x32xf32>
    tpu.vector_store %arg15[%c0_76, %c0_77, %c0_78], %174 {strides = array<i32>} : memref<1x8x32xf32, #tpu.memory_space<vmem>>, vector<1x8x32xf32>,
    return
  }
  func.func @transform_0(%arg0: i32, %arg1: i32) -> (i32, i32, i32) {
    %c0_i32 = arith.constant 0 : i32
    %c0_i32_0 = arith.constant 0 : i32
    %c0_i32_1 = arith.constant 0 : i32
    return %arg0, %c0_i32, %c0_i32_0 : i32, i32, i32
  }
  func.func @transform_1(%arg0: i32, %arg1: i32) -> (i32, i32, i32) {
    %c0_i32 = arith.constant 0 : i32
    %c0_i32_0 = arith.constant 0 : i32
    return %arg0, %arg1, %c0_i32 : i32, i32, i32
  }
  func.func @transform_2(%arg0: i32, %arg1: i32) -> (i32, i32, i32) {
    %c0_i32 = arith.constant 0 : i32
    %c0_i32_0 = arith.constant 0 : i32
    %c0_i32_1 = arith.constant 0 : i32
    return %arg0, %c0_i32, %c0_i32_0 : i32, i32, i32
  }
  func.func @transform_3(%arg0: i32, %arg1: i32) -> (i32, i32) {
    %c0_i32 = arith.constant 0 : i32
    %c0_i32_0 = arith.constant 0 : i32
    %c0_i32_1 = arith.constant 0 : i32
    return %c0_i32, %c0_i32_0 : i32, i32
  }
  func.func @transform_4(%arg0: i32, %arg1: i32) -> (i32, i32) {
    %c0_i32 = arith.constant 0 : i32
    %c0_i32_0 = arith.constant 0 : i32
    %c0_i32_1 = arith.constant 0 : i32
    return %c0_i32, %c0_i32_0 : i32, i32
  }
  func.func @transform_5(%arg0: i32, %arg1: i32) -> (i32, i32) {
    %c0_i32 = arith.constant 0 : i32
    %c0_i32_0 = arith.constant 0 : i32
    %c0_i32_1 = arith.constant 0 : i32
    return %c0_i32, %c0_i32_0 : i32, i32
  }
  func.func @transform_6(%arg0: i32, %arg1: i32) -> (i32, i32) {
    %c0_i32 = arith.constant 0 : i32
    %c0_i32_0 = arith.constant 0 : i32
    %c0_i32_1 = arith.constant 0 : i32
    return %c0_i32, %c0_i32_0 : i32, i32
  }
  func.func @transform_7(%arg0: i32, %arg1: i32) -> (i32, i32) {
    %c0_i32 = arith.constant 0 : i32
    %c0_i32_0 = arith.constant 0 : i32
    %c0_i32_1 = arith.constant 0 : i32
    return %c0_i32, %c0_i32_0 : i32, i32
  }
  func.func @transform_8(%arg0: i32, %arg1: i32) -> (i32, i32) {
    %c0_i32 = arith.constant 0 : i32
    %c0_i32_0 = arith.constant 0 : i32
    %c0_i32_1 = arith.constant 0 : i32
    return %c0_i32, %c0_i32_0 : i32, i32
  }
  func.func @transform_9(%arg0: i32, %arg1: i32) -> (i32, i32, i32) {
    %c0_i32 = arith.constant 0 : i32
    %c0_i32_0 = arith.constant 0 : i32
    %c0_i32_1 = arith.constant 0 : i32
    %c0_i32_2 = arith.constant 0 : i32
    return %c0_i32, %c0_i32_0, %c0_i32_1 : i32, i32, i32
  }
  func.func @transform_10(%arg0: i32, %arg1: i32) -> (i32, i32) {
    %c0_i32 = arith.constant 0 : i32
    %c0_i32_0 = arith.constant 0 : i32
    %c0_i32_1 = arith.constant 0 : i32
    return %c0_i32, %c0_i32_0 : i32, i32
  }
  func.func @transform_11(%arg0: i32, %arg1: i32) -> (i32, i32) {
    %c0_i32 = arith.constant 0 : i32
    %c0_i32_0 = arith.constant 0 : i32
    %c0_i32_1 = arith.constant 0 : i32
    return %c0_i32, %c0_i32_0 : i32, i32
  }
  func.func @transform_12(%arg0: i32, %arg1: i32) -> (i32, i32) {
    %c0_i32 = arith.constant 0 : i32
    %c0_i32_0 = arith.constant 0 : i32
    %c0_i32_1 = arith.constant 0 : i32
    return %c0_i32, %c0_i32_0 : i32, i32
  }
  func.func @transform_13(%arg0: i32, %arg1: i32) -> (i32, i32, i32) {
    %c0_i32 = arith.constant 0 : i32
    %c0_i32_0 = arith.constant 0 : i32
    return %arg0, %arg1, %c0_i32 : i32, i32, i32
  }
}

</mosaic_0001>

<bundles_post_ra>
// kernel: tpu_custom_call.1
= control target key start
LH: loop header
LB: loop body
LE: loop exit
PB: predicated region body
PF: predicated region fallthrough
CT: control target
= control target key end

     0   :  { %s2869_s0 = inlined_call_operand.hbm [shape: bf16[2,8,32], index: 0, kind: input, shape index: {}]   ;;  %s2870_s1 = inlined_call_operand.hbm [shape: f32[2,8,32], index: 1, kind: input, shape index: {}]   ;;  %s2871_s2 = inlined_call_operand.vmem [shape: f32[2,1,8], index: 2, kind: input, shape index: {}]   ;;  %s2872_s3 = inlined_call_operand.hbm [shape: bf16[32,32], index: 3, kind: input, shape index: {}]   ;;  %s2873_s4 = inlined_call_operand.hbm [shape: f32[1,32], index: 4, kind: input, shape index: {}]   ;;  %s2874_s5 = inlined_call_operand.vmem [shape: bf16[32,32], index: 5, kind: input, shape index: {}]   ;;  %s2875_s6 = inlined_call_operand.hbm [shape: f32[1,32], index: 6, kind: input, shape index: {}]   ;;  %s2876_s7 = inlined_call_operand.hbm [shape: bf16[32,32], index: 7, kind: input, shape index: {}]   ;;  %s2877_s8 = inlined_call_operand.hbm [shape: f32[1,32], index: 8, kind: input, shape index: {}]   ;;  %s2878_s9 = inlined_call_operand.vmem [shape: bf16[2,16,32], index: 9, kind: input, shape index: {}]   ;;  %s2879_s10 = inlined_call_operand.vmem [shape: f32[1,32], index: 10, kind: input, shape index: {}]   ;;  %s2880_s11 = inlined_call_operand.vmem [shape: f32[1,32], index: 11, kind: input, shape index: {}]   ;;  %s2881_s12 = inlined_call_operand.vmem [shape: f32[1,32], index: 12, kind: input, shape index: {}]   ;;  %s2882_s13 = inlined_call_operand.hbm [shape: f32[2,8,32], index: 13, kind: output, shape index: {}]  }
   0x1   :  { %2890 = sst [smem:[#allocation26_spill]] %s2869_s0 }
   0x2   :  { %2891 = sst [smem:[#allocation27_spill]] %s2871_s2 }
   0x3   :  { %2892 = sst [smem:[#allocation28_spill]] %s2872_s3 }
   0x4   :  { %2893 = sst [smem:[#allocation29_spill]] %s2873_s4 }
   0x5   :  { %2894 = sst [smem:[#allocation30_spill]] %s2875_s6 }
   0x6   :  { %2895 = sst [smem:[#allocation31_spill]] %s2878_s9 }
   0x7   :  { %2896 = sst [smem:[#allocation32_spill]] %s2879_s10 }
   0x8   :  { %2897 = sst [smem:[#allocation33_spill]] %s2880_s11 }
   0x9   :  { %2898 = sst [smem:[#allocation34_spill]] %s2881_s12 }
   0xa   :  { %2899 = sst [smem:[#allocation35_spill]] %s2882_s13 }
   0xb   :  { %18 = vsyncpa [#allocation7], 0 }
   0xc   :  { %20 = vsyncpa [#allocation7 + $0x1], 0 }
   0xd   :  { %21 = vsyncpa [#allocation10], 0 }
   0xe   :  { %23 = vsyncpa [#allocation10 + $0x1], 0 }
   0xf   :  { %24 = vsyncpa [#allocation13], 0 }
  0x10   :  { %25 = vsyncpa [#allocation16], 0 }
  0x11   :  { %26 = vsyncpa [#allocation8], 0 }
  0x12   :  { %28 = vsyncpa [#allocation8 + $0x1], 0  ;;  %s2368_s25 = smov 0   ;;  %s2370_s26 = smov 0  }
  0x13   :  { %s2372_s27 = smov 0   ;;  %s2374_s28 = smov 0  }
  0x14   :  { %s2376_s29 = smov 0   ;;  %s2378_s30 = smov 0  }
  0x15 LB: > { %2900 = sst [smem:[#allocation25_spill]] %s2273_s28  ;;  %s2399_s14 = sadd.s32 4294967295, %s2281_s30   ;;  %s2281_s30 = sphi %s2378_s30, %s34_s30   ;;  %s2277_s29 = sphi %s2376_s29, %s2937_s29   ;;  %s2273_s28 = sphi %s2374_s28, %s2936_s28   ;;  %s2269_s27 = sphi %s2372_s27, %s2935_s27   ;;  %s2265_s26 = sphi %s2370_s26, %s2934_s26   ;;  %s2261_s25 = sphi %s2368_s25, %s2933_s25  }
  0x16   : > { %p1647_p0 = scmp.ge.s32.totalorder %s2281_s30, 1  ;;  %p2886_p1 = scmp.eq.s32.totalorder %s2399_s14, 0 }
  0x17   : > { %p369_p2 = scmp.lt.s32.totalorder %s2281_s30, 3  ;;  %s2283_s16 = smov [#allocation11]  }
  0x18   : > { %s381_s17 = sshll.u32 %s2283_s16, 4  ;;  %s2284_s19 = smov [#allocation12]   ;;  %s2408_s17 = int_to_ptr.vmem [resolvable:$true] %s381_s17 }
  0x19   : > { %p2404_p3 = pnand %p1647_p0, %p369_p2  ;;  %s395_s20 = sshll.u32 %s2284_s19, 4  ;;  %s2419_s20 = int_to_ptr.vmem [resolvable:$true] %s395_s20 }
  0x1a   : > { %s2285_s21 = smov [#allocation15]   ;;  %s2903_s3 = sld [smem:[#allocation28_spill]] }
  0x1b   : > { %s2901_s15 = scalar_select %p2404_p3, 1, 0 }
  0x1c   : > { %p1852_p4 = pneg %p2404_p3  ;;  %s2421_s22 = sshll.u32 %s2285_s21, 4  ;;  %s420_s22 = int_to_ptr.vmem [resolvable:$true] %s2421_s22 }
  0x1e   : > { %p2415_p6 = pnand %p1852_p4, %p2886_p1 }
  0x20   : > { %s1983_s16 = scalar_lea.hbm %s2903_s3, 256  ;;  %p2431_p8 = pneg %p2415_p6 }
  0x21   : > { %p1984_p7 = scmp.ne.s32.totalorder %s2903_s3, %s1983_s16  ;;  %p1990_p11 = scmp.lt.u32.totalorder %s1983_s16, %s2903_s3 }
  0x23   : > { %p1986_p9 = pnand %p2431_p8, %p1984_p7 }
  0x25   : > { %p1987_p10 = pneg %p1986_p9 }
  0x27   : > { %p1992_p12 = pnand %p1990_p11, %p1987_p10 }
  0x29   : > { %1995 = shalt.err (!%p1992_p12)
}
  0x2a   : > { %s1996_s12 = scalar_lea.vmem %s2408_s17, 256  ;;  %p2004_p4 = scmp.lt.s32.totalorder %s2408_s17, %s2408_s17 }
  0x2b   : > { %p1997_p13 = scmp.ne.s32.totalorder %s2408_s17, %s1996_s12  ;;  %p2005_p5 = scmp.lt.s32.totalorder %s1996_s12, %s1996_s12 }
  0x2d   : > { %p1999_p0 = pnand %p1997_p13, %p2431_p8  ;;  %p2006_p7 = por %p2005_p5, %p2004_p4 }
  0x2f   : > { %p2000_p2 = pneg %p1999_p0 }
  0x31   : > { %p2007_p9 = pnand %p2006_p7, %p2000_p2 }
  0x33   : > { %2010 = shalt.err (!%p2007_p9)
}
  0x34   : > { %s2286_s13 = smov 64   ;;  %s2287_s23 = smov 4  }
  0x35   : > { %1855 = dma.hbm_to_vmem [thread:$0]  (!%p2415_p6), %s2903_s3, 256, %s2408_s17, [#allocation10], %s2286_s13, %s2286_s13, %s2287_s23  }
  0x36   : > { %s2905_s4 = sld [smem:[#allocation29_spill]] }
  0x3c   : > { %s2011_s12 = scalar_lea.hbm %s2905_s4, 16 }
  0x3d   : > { %p2012_p5 = scmp.ne.s32.totalorder %s2905_s4, %s2011_s12  ;;  %p2018_p12 = scmp.lt.u32.totalorder %s2011_s12, %s2905_s4 }
  0x3f   : > { %p2014_p10 = pnand %p2012_p5, %p2431_p8 }
  0x41   : > { %p2015_p11 = pneg %p2014_p10 }
  0x43   : > { %p2020_p13 = pnand %p2018_p12, %p2015_p11 }
  0x45   : > { %2023 = shalt.err (!%p2020_p13)
}
  0x46   : > { %s2024_s17 = scalar_lea.vmem %s2419_s20, 16  ;;  %s2031_s9 = scalar_lea.vmem %s2419_s20, 32 }
  0x47   : > { %p2025_p0 = scmp.ne.s32.totalorder %s2419_s20, %s2024_s17  ;;  %p2032_p7 = scmp.lt.s32.totalorder %s2419_s20, %s2419_s20 }
  0x48   : > { %p2033_p9 = scmp.lt.s32.totalorder %s2031_s9, %s2024_s17 }
  0x49   : > { %p2027_p2 = pnand %p2025_p0, %p2431_p8 }
  0x4a   : > { %p2034_p5 = por %p2033_p9, %p2032_p7 }
  0x4b   : > { %p2028_p4 = pneg %p2027_p2 }
  0x4d   : > { %p2035_p10 = pnand %p2034_p5, %p2028_p4 }
  0x4f   : > { %2038 = shalt.err (!%p2035_p10)
}
  0x50   : > { %1858 = dma.hbm_to_vmem [thread:$0]  (!%p2415_p6), %s2905_s4, 16, %s2419_s20, [#allocation13]  }
  0x51   : > { %s2039_s16 = scalar_lea.hbm %s2876_s7, 256 }
  0x52   : > { %p2040_p11 = scmp.ne.s32.totalorder %s2876_s7, %s2039_s16  ;;  %p2046_p0 = scmp.lt.u32.totalorder %s2039_s16, %s2876_s7 }
  0x54   : > { %p2042_p12 = pnand %p2040_p11, %p2431_p8 }
  0x56   : > { %p2043_p13 = pneg %p2042_p12 }
  0x58   : > { %p2048_p2 = pnand %p2046_p0, %p2043_p13 }
  0x5a   : > { %2051 = shalt.err (!%p2048_p2)
}
  0x5b   : > { %s2052_s9 = scalar_lea.vmem %s420_s22, 256  ;;  %p2060_p5 = scmp.lt.s32.totalorder %s420_s22, %s420_s22 }
  0x5c   : > { %p2053_p4 = scmp.ne.s32.totalorder %s420_s22, %s2052_s9  ;;  %p2061_p10 = scmp.lt.s32.totalorder %s2052_s9, %s2052_s9 }
  0x5e   : > { %p2055_p7 = pnand %p2053_p4, %p2431_p8  ;;  %p2062_p1 = por %p2061_p10, %p2060_p5 }
  0x60   : > { %p2056_p9 = pneg %p2055_p7 }
  0x62   : > { %p2063_p3 = pnand %p2062_p1, %p2056_p9 }
  0x64   : > { %2066 = shalt.err (!%p2063_p3)
}
  0x65   : > { %1864 = dma.hbm_to_vmem [thread:$0]  (!%p2415_p6), %s2876_s7, 256, %s420_s22, [#allocation16], %s2286_s13, %s2286_s13, %s2287_s23  }
  0x66   : > { %s2288_s10 = smov [#allocation14]   ;;  %s2289_s24 = smov [#allocation17]  }
  0x67   : > { %s409_s28 = sshll.u32 %s2288_s10, 4  ;;  %s433_s16 = sshll.u32 %s2289_s24, 4  ;;  %s410_s28 = int_to_ptr.vmem [resolvable:$true] %s409_s28  ;;  %s434_s16 = int_to_ptr.vmem [resolvable:$true] %s433_s16 }
  0x68   : > { %s2906_s6 = sld [smem:[#allocation30_spill]] }
  0x6e   : > { %s2067_s12 = scalar_lea.hbm %s2906_s6, 16 }
  0x6f   : > { %p2068_p1 = scmp.ne.s32.totalorder %s2906_s6, %s2067_s12  ;;  %p2074_p12 = scmp.lt.u32.totalorder %s2067_s12, %s2906_s6 }
  0x71   : > { %p2070_p3 = pnand %p2068_p1, %p2431_p8 }
  0x73   : > { %p2071_p11 = pneg %p2070_p3 }
  0x75   : > { %p2076_p13 = pnand %p2074_p12, %p2071_p11 }
  0x77   : > { %2079 = shalt.err (!%p2076_p13)
}
  0x78   : > { %s2080_s22 = scalar_lea.vmem %s410_s28, 16  ;;  %s2087_s13 = scalar_lea.vmem %s410_s28, 32 }
  0x79   : > { %p2081_p0 = scmp.ne.s32.totalorder %s410_s28, %s2080_s22  ;;  %p2088_p7 = scmp.lt.s32.totalorder %s410_s28, %s410_s28 }
  0x7a   : > { %p2089_p9 = scmp.lt.s32.totalorder %s2087_s13, %s2080_s22 }
  0x7b   : > { %p2083_p2 = pnand %p2081_p0, %p2431_p8 }
  0x7c   : > { %p2090_p5 = por %p2089_p9, %p2088_p7 }
  0x7d   : > { %p2084_p4 = pneg %p2083_p2 }
  0x7f   : > { %p2091_p10 = pnand %p2090_p5, %p2084_p4 }
  0x81   : > { %2094 = shalt.err (!%p2091_p10)
}
  0x82   : > { %1861 = dma.hbm_to_vmem [thread:$0]  (!%p2415_p6), %s2906_s6, 16, %s410_s28, [#allocation13]  }
  0x83   : > { %s2095_s24 = scalar_lea.hbm %s2877_s8, 16 }
  0x84   : > { %p2096_p1 = scmp.ne.s32.totalorder %s2877_s8, %s2095_s24  ;;  %p2102_p12 = scmp.lt.u32.totalorder %s2095_s24, %s2877_s8 }
  0x86   : > { %p2098_p3 = pnand %p2096_p1, %p2431_p8 }
  0x88   : > { %p2099_p11 = pneg %p2098_p3 }
  0x8a   : > { %p2104_p13 = pnand %p2102_p12, %p2099_p11 }
  0x8c   : > { %2107 = shalt.err (!%p2104_p13)
}
  0x8d   : > { %s2108_s9 = scalar_lea.vmem %s434_s16, 16  ;;  %s2115_s28 = scalar_lea.vmem %s434_s16, 32 }
  0x8e   : > { %p2109_p0 = scmp.ne.s32.totalorder %s434_s16, %s2108_s9  ;;  %p2116_p7 = scmp.lt.s32.totalorder %s434_s16, %s434_s16 }
  0x8f   : > { %p2117_p9 = scmp.lt.s32.totalorder %s2115_s28, %s2108_s9 }
  0x90   : > { %p2111_p2 = pnand %p2109_p0, %p2431_p8 }
  0x91   : > { %p2118_p5 = por %p2117_p9, %p2116_p7 }
  0x92   : > { %p2112_p4 = pneg %p2111_p2 }
  0x94   : > { %p2119_p10 = pnand %p2118_p5, %p2112_p4 }
  0x96   : > { %2122 = shalt.err (!%p2119_p10)
}
  0x97   : > { %1867 = dma.hbm_to_vmem [thread:$0]  (!%p2415_p6), %s2877_s8, 16, %s434_s16, [#allocation16]  }
  0x98   : > { %s1646_s11 = sadd.s32 4294967294, %s2281_s30   ;;  %s46_s13 = sadd.s32 1, %s2277_s29 }
  0x99   : > { %s53_s18 = sadd.s32 1, %s2269_s27  ;;  %p48_p8 = scmp.ge.s32.totalorder %s46_s13, 2 }
  0x9a   : > { %p60_p1 = scmp.ne.s32.totalorder %s2269_s27, %s2265_s26  ;;  %p61_p3 = scmp.eq.s32.totalorder %s2281_s30, 0 }
  0x9b   : > { %p66_p11 = scmp.ne.s32.totalorder %s2265_s26, %s2261_s25  ;;  %s2939_s13 = smov (%p48_p8, %s46_s13), 0 }
  0x9c   : > { %p2547_p12 = por %p61_p3, %p60_p1  ;;  %p2908_p13 = scmp.eq.s32.totalorder %s2399_s14, 0 }
  0x9d   : > { %s50_s2 = ssub.s32 %s2277_s29, %s2939_s13  ;;  %p356_p0 = scmp.eq.s32.totalorder %s2399_s14, 1 }
  0x9e   : > { %p2553_p6 = por %p2908_p13, %p66_p11  ;;  %p51_p2 = scmp.eq.s32.totalorder %s50_s2, 0 }
  0x9f   : > { %p362_p4 = scmp.eq.s32.totalorder %s1646_s11, 1  ;;  %p2560_p7 = por %p356_p0, %p60_p1 }
  0xa0   : > { %s2909_s16 = scalar_select %p2553_p6, 1, 0 }
  0xa1   : > { %s2910_s3 = scalar_select %p2560_p7, 1, 0 }
  0xa2   : > { %p1884_p9 = scmp.lt.s32.totalorder %s2281_s30, 2  ;;  %p2568_p5 = por %p362_p4, %p66_p11 }
  0xa3   : > { %s2566_s10 = scalar_select %p51_p2, %s2269_s27, %s53_s18  }
  0xa4   : > { %s2911_s24 = scalar_select %p2568_p5, 1, 0 }
  0xa5   : > { %s2573_s19 = sand.u32 1, %s2269_s27   ;;  %s1655_s12 = sshll.u32 %s2277_s29, 6 }
  0xa6   : > { %s1654_s21 = sshll.u32 %s2573_s19, 2  ;;  %s2912_s0 = sld [smem:[#allocation26_spill]] }
  0xa7   : > { %s460_s20 = scalar_lea.vmem [#allocation6], %s1654_s21  ;;  %p2586_p10 = pnand %p1884_p9, %p2547_p12 }
  0xa8   : > { %s467_s22 = sshll.u32 %s460_s20, 4  ;;  %s1656_s2 = sshll.u32 %s2573_s19, 3  ;;  %s2582_s22 = int_to_ptr.vmem [resolvable:$true] %s467_s22 }
  0xa9   : > { %s457_s17 = scalar_lea.sflag [#allocation7], %s2573_s19  ;;  %p2125_p1 = pneg %p2586_p10 }
  0xac   : > { %s2580_s28 = scalar_lea.hbm %s2912_s0, %s1655_s12  ;;  %s2128_s23 = scalar_lea.hbm %s2912_s0, 128 }
  0xad   : > { %s2123_s12 = scalar_lea.hbm %s2580_s28, 64  ;;  %p2129_p12 = scmp.lt.u32.totalorder %s2580_s28, %s2912_s0 }
  0xae   : > { %p2124_p8 = scmp.ne.s32.totalorder %s2580_s28, %s2123_s12  ;;  %p2130_p13 = scmp.lt.u32.totalorder %s2128_s23, %s2123_s12 }
  0xaf   : > { %p2132_p2 = scmp.lt.u32.totalorder %s2123_s12, %s2580_s28 }
  0xb0   : > { %p2126_p3 = pnand %p2125_p1, %p2124_p8  ;;  %p2131_p0 = por %p2130_p13, %p2129_p12 }
  0xb2   : > { %p2127_p11 = pneg %p2126_p3  ;;  %p2133_p4 = por %p2132_p2, %p2131_p0 }
  0xb4   : > { %p2134_p9 = pnand %p2133_p4, %p2127_p11 }
  0xb6   : > { %2137 = shalt.err (!%p2134_p9)
}
  0xb7   : > { %s2138_s18 = scalar_lea.vmem %s2582_s22, 64  ;;  %s2290_s21 = smov [#allocation6]  }
  0xb8   : > { %p2139_p8 = scmp.ne.s32.totalorder %s2582_s22, %s2138_s18  ;;  %s2143_s9 = sshll.u32 %s2290_s21, 4  ;;  %s2144_s9 = int_to_ptr.vmem [resolvable:$false] %s2143_s9 }
  0xb9   : > { %s2145_s4 = scalar_lea.vmem %s2144_s9, 128  ;;  %p2146_p7 = scmp.lt.s32.totalorder %s2582_s22, %s2144_s9 }
  0xba   : > { %p2141_p3 = pnand %p2139_p8, %p2125_p1  ;;  %p2147_p12 = scmp.lt.s32.totalorder %s2145_s4, %s2138_s18 }
  0xbc   : > { %p2142_p5 = pneg %p2141_p3  ;;  %p2148_p13 = por %p2147_p12, %p2146_p7 }
  0xbe   : > { %p2149_p0 = pnand %p2148_p13, %p2142_p5 }
  0xc0   : > { %2152 = shalt.err (!%p2149_p0)
}
  0xc1   : > { %1871 = dma.hbm_to_vmem [thread:$0]  (!%p2586_p10), %s2580_s28, 64, %s2582_s22, %s457_s17  }
  0xc2   : > { %s1657_s12 = sshll.u32 %s2277_s29, 7  ;;  %s478_s18 = scalar_lea.vmem [#allocation9], %s1656_s2 }
  0xc3   : > { %s2622_s21 = scalar_lea.hbm %s2870_s1, %s1657_s12  ;;  %s486_s9 = sshll.u32 %s478_s18, 4  ;;  %s487_s9 = int_to_ptr.vmem [resolvable:$true] %s486_s9 }
  0xc4   : > { %s2914_s4 = sand.u32 1, %s2281_s30   ;;  %s2153_s6 = scalar_lea.hbm %s2622_s21, 128 }
  0xc5   : > { %s475_s0 = scalar_lea.sflag [#allocation10], %s2914_s4  ;;  %p2154_p7 = scmp.ne.s32.totalorder %s2622_s21, %s2153_s6 }
  0xc6   : > { %s2158_s17 = scalar_lea.hbm %s2870_s1, 256  ;;  %p2159_p2 = scmp.lt.u32.totalorder %s2622_s21, %s2870_s1 }
  0xc7   : > { %p2156_p5 = pnand %p2154_p7, %p2125_p1  ;;  %p2160_p4 = scmp.lt.u32.totalorder %s2158_s17, %s2153_s6 }
  0xc8   : > { %p2162_p8 = scmp.lt.u32.totalorder %s2153_s6, %s2622_s21 }
  0xc9   : > { %p2157_p11 = pneg %p2156_p5  ;;  %p2161_p9 = por %p2160_p4, %p2159_p2 }
  0xcb   : > { %p2163_p3 = por %p2162_p8, %p2161_p9 }
  0xcd   : > { %p2164_p12 = pnand %p2163_p3, %p2157_p11 }
  0xcf   : > { %2167 = shalt.err (!%p2164_p12)
}
  0xd0   : > { %s2168_s2 = scalar_lea.vmem %s487_s9, 128  ;;  %s2291_s23 = smov [#allocation9]  }
  0xd1   : > { %p2169_p13 = scmp.ne.s32.totalorder %s487_s9, %s2168_s2  ;;  %s2173_s20 = sshll.u32 %s2291_s23, 4  ;;  %s2174_s20 = int_to_ptr.vmem [resolvable:$false] %s2173_s20 }
  0xd2   : > { %s2175_s18 = scalar_lea.vmem %s2174_s20, 256  ;;  %p2176_p5 = scmp.lt.s32.totalorder %s487_s9, %s2174_s20 }
  0xd3   : > { %p2171_p0 = pnand %p2169_p13, %p2125_p1  ;;  %p2177_p6 = scmp.lt.s32.totalorder %s2175_s18, %s2168_s2 }
  0xd5   : > { %p2172_p7 = pneg %p2171_p0  ;;  %p2178_p2 = por %p2177_p6, %p2176_p5 }
  0xd7   : > { %p2179_p4 = pnand %p2178_p2, %p2172_p7 }
  0xd9   : > { %2182 = shalt.err (!%p2179_p4)
}
  0xda   : > { %1874 = dma.hbm_to_vmem [thread:$0]  (!%p2586_p10), %s2622_s21, 128, %s487_s9, %s475_s0  }
  0xdb   : > { %p2915_p11 = scmp.ne.s32.totalorder %s2901_s15, 0 }
  0xdc   : > { %s2650_s6 = sand.u32 (!%p2915_p11), 1, %s2265_s26   ;;  %p2916_p6 = scmp.ne.s32.totalorder (!%p2915_p11), %s2909_s16, 0 }
  0xdd   : > { %501 = sbr.rel (%p2915_p11) target bundleno = 2252 (0x8cc), region = 72  ;;  %s1659_s4 = sshll.u32 (!%p2915_p11), %s2650_s6, 2 }
  0xde   : > { %s504_s28 = scalar_lea.sflag (!%p2915_p11), [#allocation7], %s2650_s6  ;;  %s2654_s22 = scalar_lea.vmem (!%p2915_p11), [#allocation6], %s1659_s4 }
  0xe4   : > { %2236 = dma.done.wait (%p2916_p6), %s504_s28, 64  }
  0xe5   : > { %2238 = vsyncadd (%p2916_p6), %s504_s28, 4294967232  ;;  %s512_s0 = sand.u32 1, %s2399_s14   ;;  %s1660_s15 = sshll.u32 %s2650_s6, 3 }
  0xe6   : > { %s513_s11 = scalar_lea.sflag [#allocation10], %s512_s0  ;;  %s2664_s21 = scalar_lea.vmem [#allocation9], %s1660_s15 }
  0xe7   : > { %2240 = dma.done.wait (%p2916_p6), %s513_s11, 128  }
  0xe8   : > { %2242 = vsyncadd (%p2916_p6), %s513_s11, 4294967168  ;;  %p2917_p10 = scmp.eq.s32.totalorder %s2399_s14, 0 }
  0xea   : > { %2244 = dma.done.wait (%p2917_p10), [#allocation10], 256   ;;  %p2918_p1 = pmov %p2917_p10 }
  0xec   : > { %2246 = vsyncadd (%p2918_p1), [#allocation10], 4294967040  ;;  %p2919_p9 = pmov %p2918_p1 }
  0xed   : > { %p2920_p8 = pmov %p2918_p1 }
  0xee   : > { %2248 = dma.done.wait (%p2919_p9), [#allocation13], 32  }
  0xef   : > { %2250 = vsyncadd (%p2920_p8), [#allocation13], 4294967264  ;;  %p2921_p3 = pmov %p2918_p1 }
  0xf0   : > { %p2922_p12 = pmov %p2918_p1 }
  0xf1   : > { %2252 = dma.done.wait (%p2921_p3), [#allocation16], 272  }
  0xf2   : > { %2254 = vsyncadd (%p2922_p12), [#allocation16], 4294967024  ;;  %vm620_vm0 = vcmask 261120   ;;  %v2292_v0 = vmov 0.0   ;;  %vm2293_vm1 = vmmov 0   ;;  %v1951_v1 = vld [vmem:[%s2874_s5] sm:$0xff]  }
  0xf3   : > { %1742 = vmatprep.subr.bf16.mxu0 %v2292_v0  ;;  %1746 = vmatprep.mubr.msk.bf16.mxu0 %vm2293_vm1, %v2292_v0  ;;  %832 = vst.msk [vmem:[#allocation5] sm:$0xff] %vm620_vm0, %v2292_v0  ;;  %v1952_v2 = vld [vmem:[%s2874_s5 + $0x8] sm:$0xff]   ;;  %v596_v3 = vld [vmem:[%s2654_s22] sm:$0xf]  ;;  %v1953_v4 = vld [vmem:[#allocation11] sm:$0xff]   ;;  %vm665_vm2 = vcmask 125952  }
  0xf4   : > { %1750 = vmatprep.subr.bf16.mxu1 %v2292_v0  ;;  %1754 = vmatprep.mubr.msk.bf16.mxu1 %vm2293_vm1, %v2292_v0  ;;  %v1954_v5 = vld [vmem:[#allocation11 + $0x8] sm:$0xff]   ;;  %v1955_v7 = vld [vmem:[#allocation15] sm:$0xff]   ;;  %v1956_v8 = vld [vmem:[#allocation15 + $0x8] sm:$0xff]   ;;  %s2294_s19 = smov 112   ;;  %vm842_vm3 = vcmask 64512   ;;  %s2295_s12 = smov 120  }
  0xf5   : > { %1743 = vmatpush3.bf16.msra.mxu0 %v1951_v1  ;;  %v753_v6 = vld [vmem:[%s2654_s22] sm:$0xf]  ;;  %1751 = vmatpush3.bf16.msra.mxu1 %v1955_v7  ;;  %v1667_v9 = vld [vmem:[#allocation14] ss:$0 sm:$0xff]  ;;  %v1677_v16 = vld [vmem:[#allocation12] ss:$0 sm:$0xff] }
  0xf6   : > { %1744 = vmatprep.subr.bf16.mxu0 %v2292_v0  ;;  %1752 = vmatprep.subr.bf16.mxu1 %v2292_v0  ;;  %v1672_v28 = vld [vmem:[#allocation17] ss:$0 sm:$0xff]  ;;  %s2923_s2 = sld [smem:[#allocation25_spill]]  ;;  %vm905_vm4 = vcmask 1043456   ;;  %s2924_s4 = sld [smem:[#allocation27_spill]]  ;;  %vm1088_vm5 = vcmask 130048  }
  0xf7   : > { %s2925_s11 = sld [smem:[#allocation31_spill]]  ;;  %s2296_s14 = smov 8  }
  0xf8   : > { %s2927_s20 = sld [smem:[#allocation33_spill]]  ;;  %s586_s0 = scalar_lea.vmem [#allocation18], %s1660_s15 }
  0xf9   : > { %1745 = vmatpush3.bf16.msra.mxu0 %v1952_v2  ;;  %1753 = vmatpush3.bf16.msra.mxu1 %v1956_v8  ;;  %s2929_s17 = sld [smem:[#allocation35_spill]]  ;;  %p2930_p7 = scmp.ne.s32.totalorder %s2910_s3, 0 }
  0xfa   : > { %1758 = vmatprep.subr.bf16.mxu0 %v2292_v0  ;;  %1766 = vmatprep.subr.bf16.mxu1 %v2292_v0  ;;  %s2297_s15 = smov [#allocation18]  }
  0xfc   : > { %1747 = vmatmul.mubr.msk.bf16.vlgmr.msra.gmra.mrb[0].mxu0 %vm620_vm0, %v596_v3  ;;  %1755 = vmatmul.mubr.msk.bf16.vlgmr.msra.gmra.mrb[0].mxu1 %vm620_vm0, %v596_v3  ;;  %p587_p13 = scmp.lt.s32.totalorder %s2923_s2, 1  ;;  %s1707_s22 = sshll.u32 %s2923_s2, 7 }
  0xfd   : > { %1759 = vmatpush3.bf16.msra.mxu0 %v1953_v4  ;;  %1762 = vmatprep.mubr.msk.bf16.mxu0 %vm2293_vm1, %v2292_v0 }
  0xfe   : > { %1760 = vmatprep.subr.bf16.mxu0 %v2292_v0  ;;  %1768 = vmatprep.mubr.msk.bf16.mxu1 %vm2293_vm1, %v2292_v0  ;;  %s588_s23 = scalar_select %p587_p13, %s2923_s2, 1 }
  0xff   : > { %s2187_s2 = sshll.u32 %s2297_s15, 4  ;;  %s2188_s2 = int_to_ptr.vmem [resolvable:$false] %s2187_s2 }
 0x100   : > { %s589_s28 = scalar_lea.vmem %s2924_s4, %s588_s23  ;;  %s2189_s23 = scalar_lea.vmem %s2188_s2, 256 }
 0x101   : > { %1761 = vmatpush3.bf16.msra.mxu0 %v1954_v5  ;;  %v2739_v42 = vld [vmem:[%s589_s28] ss:$0 sm:$0xff]  ;;  %s2928_s28 = sld [smem:[#allocation34_spill]] }
 0x102   : > { %1772 = vmatprep.subr.bf16.mxu0 %v2292_v0 }
 0x104   : > { %1763 = vmatmul.mubr.msk.bf16.vlgmr.msra.gmra.mrb[4].mxu0 %vm620_vm0, %v753_v6 }
 0x105   : > { %1774 = vmatprep.mubr.msk.bf16.mxu0 %vm2293_vm1, %v2292_v0 }
 0x1cf   : > { %v658_v10 = vpop.f32.mrb[0].mxu0  ;;  %v732_v29 = vpop.f32.mrb[0].mxu1 }
 0x1d0   : > { %v659_v11 = vadd.f32 %v1667_v9, %v658_v10  ;;  %v1748_v12 = vpop.f32.mrb[1].mxu0  ;;  %v733_v30 = vadd.f32 %v1672_v28, %v732_v29  ;;  %v1756_v31 = vpop.f32.mrb[1].mxu1 }
 0x1d1   : > { %v661_v13 = vpop.f32.mrb[2].mxu0  ;;  %v735_v32 = vpop.f32.mrb[2].mxu1 }
 0x1d2   : > { %v664_v14 = vpack.c.bf16 %v659_v11, %v659_v11  ;;  %v1749_v15 = vpop.f32.mrb[3].mxu0  ;;  %v738_v33 = vpack.c.bf16 %v733_v30, %v733_v30  ;;  %v1757_v34 = vpop.f32.mrb[3].mxu1 }
 0x1d4   : > { %666 = vst.msk [vmem:[#allocation2] sm:$0xf] %vm665_vm2, %v664_v14  ;;  %670 = vrot.lane.b32.xlu1 %v664_v14, %s2294_s19  ;;  %739 = vst.msk [vmem:[#allocation3] sm:$0xf] %vm665_vm2, %v738_v33 }
 0x1d7   : > { %v815_v17 = vpop.f32.mrb[4].mxu0 }
 0x1d8   : > { %v816_v18 = vadd.f32 %v1677_v16, %v815_v17  ;;  %v1764_v19 = vpop.f32.mrb[5].mxu0 }
 0x1d9   : > { %v818_v20 = vpop.f32.mrb[6].mxu0 }
 0x1da   : > { %v821_v21 = vpack.c.bf16 %v816_v18, %v816_v18  ;;  %v1765_v22 = vpop.f32.mrb[7].mxu0 }
 0x1db   : > { %v834_v23 = vld [vmem:[#allocation2] sm:$0xf]  ;;  %v835_v40 = vld [vmem:[#allocation3] sm:$0xf] }
 0x1dc   : > { %823 = vst.msk [vmem:[#allocation4] sm:$0xf] %vm665_vm2, %v821_v21  ;;  %v847_v24 = vsel %vm842_vm3, %v834_v23, 0  ;;  %827 = vrot.lane.b32.xlu1 %v821_v21, %s2294_s19  ;;  %v1686_v25 = vcombine.low %v834_v23, %v834_v23  ;;  %v907_v41 = vsel %vm905_vm4, %v835_v40, 0  ;;  %v1688_v49 = vcombine.low %v835_v40, %v835_v40 }
 0x1dd   : > { %1767 = vmatpush3.bf16.xpose.msra.mxu1 %v847_v24  ;;  %1773 = vmatpush3.bf16.msra.mxu0 %v907_v41  ;;  %v1963_v41 = vld [vmem:[%s2925_s11] sm:$0xff]  }
 0x1de   : > { %959 = vrot.lane.b32.xlu0 %v1686_v25, %s2295_s12  ;;  %1778 = vmatprep.subr.bf16.mxu1 %v2292_v0 }
 0x1df   : > { %1784 = vmatprep.subr.bf16.mxu0 %v2292_v0 }
 0x1e3   : > { %v833_v26 = vld [vmem:[#allocation4] sm:$0xf] }
 0x1e4   : > { %1769 = vmatmul.mubr.msk.bf16.vlgmr.msra.gmra.mrb[4].mxu1 %vm842_vm3, %v833_v26  ;;  %v1685_v27 = vcombine.low %v833_v26, %v833_v26 }
 0x1e5   : > { %1780 = vmatprep.mubr.msk.bf16.mxu1 %vm2293_vm1, %v2292_v0 }
 0x1e6   : > { %954 = vrot.lane.b32.xlu0 %v1685_v27, %s2295_s12 }
 0x246   : > { %v671_v35 = vpop.permute.xlu1 %670 }
 0x247   : > { %674 = vst.msk [vmem:[#allocation2 + $0x4] sm:$0xf] %vm665_vm2, %v671_v35 }
 0x24e   : > { %v828_v36 = vpop.permute.xlu1 %827  ;;  %v1135_v58 = vld [vmem:[#allocation2 + $0x4] sm:$0xf] }
 0x24f   : > { %831 = vst.msk [vmem:[#allocation4 + $0x4] sm:$0xf] %vm665_vm2, %v828_v36  ;;  %v1695_v59 = vcombine.low %v1135_v58, %v1135_v58  ;;  %v1142_v13 = vsel %vm842_vm3, %v1135_v58, 0 }
 0x250   : > { %v960_v37 = vpop.permute.xlu0 %959 }
 0x251   : > { %v965_v38 = vsel %vm842_vm3, %v960_v37, 0 }
 0x252   : > { %1779 = vmatpush3.bf16.xpose.msra.mxu1 %v965_v38 }
 0x253   : > { %1790 = vmatprep.subr.bf16.mxu1 %v2292_v0 }
 0x256   : > { %v1133_v50 = vld [vmem:[#allocation4 + $0x4] sm:$0xf] }
 0x257   : > { %v1694_v51 = vcombine.low %v1133_v50, %v1133_v50 }
 0x258   : > { %v955_v39 = vpop.permute.xlu0 %954 }
 0x259   : > { %1781 = vmatmul.mubr.msk.bf16.vlgmr.msra.gmra.mrb[8].mxu1 %vm842_vm3, %v955_v39 }
 0x25a   : > { %1792 = vmatprep.mubr.msk.bf16.mxu1 %vm2293_vm1, %v2292_v0  ;;  %1791 = vmatpush3.bf16.msra.mxu1 %v1963_v41 }
 0x25b   : > { %1802 = vmatprep.subr.bf16.mxu1 %v2292_v0 }
 0x2b7   : > { %v883_v43 = vpop.f32.mrb[4].mxu1 }
 0x2b8   : > { %v884_v44 = vadd.f32 %v2739_v42, %v883_v43  ;;  %v1770_v45 = vpop.f32.mrb[5].mxu1 }
 0x2b9   : > { %v886_v46 = vpop.f32.mrb[6].mxu1 }
 0x2ba   : > { %v1771_v47 = vpop.f32.mrb[7].mxu1  ;;  %v889_v48 = vsel %vm842_vm3, %v884_v44, -inf }
 0x2bb   : > { %890 = vmax.xlane.f32.xlu0 %v889_v48 }
 0x2d1   : > { %1023 = vrot.lane.b32.xlu0 %v1688_v49, %s2295_s12 }
 0x2d5   : > { %1248 = vrot.lane.b32.xlu0 %v1694_v51, %s2295_s12 }
 0x2d9   : > { %743 = vrot.lane.b32.xlu0 %v738_v33, %s2294_s19  ;;  %s2819_s19 = scalar_lea.hbm %s2929_s17, %s1707_s22 }
 0x32c   : > { %v1001_v52 = vpop.f32.mrb[8].mxu1 }
 0x32d   : > { %v1002_v53 = vadd.f32 %v2739_v42, %v1001_v52  ;;  %v1782_v54 = vpop.f32.mrb[9].mxu1 }
 0x32e   : > { %v1004_v55 = vpop.f32.mrb[10].mxu1 }
 0x32f   : > { %v1783_v56 = vpop.f32.mrb[11].mxu1  ;;  %v1007_v57 = vsel %vm842_vm3, %v1002_v53, -inf }
 0x330   : > { %1008 = vmax.xlane.f32.xlu1 %v1007_v57 }
 0x341   : > { %1253 = vrot.lane.b32.xlu1 %v1695_v59, %s2295_s12 }
 0x348   : > { %v891_v60 = vpop.xlane.xlu0 %890 }
 0x349   : > { %v892_v61 = vsub.f32 %v884_v44, %v891_v60 }
 0x34b   : > { %v893_v62 = vpack.c.bf16 %v892_v61, %v892_v61 }
 0x34c   : > { %v1024_v63 = vpop.permute.xlu0 %1023 }
 0x34d   : > { %v895_v1 = vmul.bf16 1069105081, %v893_v62  ;;  %v1029_v4 = vsel %vm905_vm4, %v1024_v63, 0 }
 0x34f   : > { %1965 = vpow.bf16 %v895_v1 }
 0x350   : > { %v1249_v2 = vpop.permute.xlu0 %1248 }
 0x354   : > { %v744_v3 = vpop.permute.xlu0 %743 }
 0x355   : > { %747 = vst.msk [vmem:[#allocation3 + $0x4] sm:$0xf] %vm665_vm2, %v744_v3 }
 0x35a   : > { %v1966_v5 = vpop.eup %1965 }
 0x35b   : > { %1775 = vmatmul.mubr.msk.bf16.vlgmr.msra.gmra.mrb[8].mxu0 %vm842_vm3, %v1966_v5  ;;  %v897_v6 = vunpack.c.l.bf16 %v1966_v5  ;;  %v1964_v5 = vld [vmem:[%s2925_s11 + $0x8] sm:$0xff]  }
 0x35c   : > { %1785 = vmatpush3.bf16.msra.mxu0 %v1029_v4  ;;  %1786 = vmatprep.mubr.msk.bf16.mxu0 %vm2293_vm1, %v2292_v0 }
 0x35d   : > { %v898_v7 = vsel %vm842_vm3, %v897_v6, 0.0  ;;  %1796 = vmatprep.subr.bf16.mxu0 %v2292_v0  ;;  %v1079_v6 = vld [vmem:[#allocation5] sm:$0xff] }
 0x35e   : > { %899 = vadd.xlane.f32.xlu0 %v898_v7 }
 0x3bd   : > { %v1009_v8 = vpop.xlane.xlu1 %1008 }
 0x3be   : > { %v1010_v9 = vsub.f32 %v1002_v53, %v1009_v8 }
 0x3c0   : > { %v1011_v10 = vpack.c.bf16 %v1010_v9, %v1010_v9 }
 0x3c1   : > { %v1254_v16 = vpop.permute.xlu1 %1253 }
 0x3c2   : > { %v1013_v11 = vmul.bf16 1069105081, %v1011_v10  ;;  %v1259_v17 = vsel %vm842_vm3, %v1254_v16, 0 }
 0x3c4   : > { %1967 = vpow.bf16 %v1013_v11 }
 0x3cf   : > { %v1968_v12 = vpop.eup %1967 }
 0x3d0   : > { %1787 = vmatmul.mubr.msk.bf16.vlgmr.msra.gmra.mrb[12].mxu0 %vm842_vm3, %v1968_v12  ;;  %v1015_v14 = vunpack.c.l.bf16 %v1968_v12 }
 0x3d1   : > { %1797 = vmatpush3.bf16.xpose.msra.mxu0 %v1142_v13  ;;  %1798 = vmatprep.mubr.msk.bf16.mxu0 %vm2293_vm1, %v2292_v0 }
 0x3d2   : > { %v1016_v15 = vsel %vm842_vm3, %v1015_v14, 0.0  ;;  %1808 = vmatprep.subr.bf16.mxu0 %v2292_v0 }
 0x3d3   : > { %1017 = vadd.xlane.f32.xlu1 %v1016_v15 }
 0x3d8   : > { %1799 = vmatmul.mubr.msk.bf16.vlgmr.msra.gmra.mrb[16].mxu0 %vm842_vm3, %v1133_v50 }
 0x3d9   : > { %1809 = vmatpush3.bf16.xpose.msra.mxu0 %v1259_v17  ;;  %1810 = vmatprep.mubr.msk.bf16.mxu0 %vm2293_vm1, %v2292_v0 }
 0x3da   : > { %1820 = vmatprep.subr.bf16.mxu0 %v2292_v0 }
 0x3e0   : > { %1811 = vmatmul.mubr.msk.bf16.vlgmr.msra.gmra.mrb[20].mxu0 %vm842_vm3, %v1249_v2 }
 0x3e1   : > { %1822 = vmatprep.mubr.msk.bf16.mxu0 %vm2293_vm1, %v2292_v0  ;;  %1821 = vmatpush3.bf16.msra.mxu0 %v1964_v5 }
 0x3eb   : > { %v900_v45 = vpop.xlane.xlu0 %899 }
 0x42e   : > { %v943_v18 = vpop.f32.mrb[8].mxu0 }
 0x42f   : > { %v1776_v19 = vpop.f32.mrb[9].mxu0 }
 0x430   : > { %v946_v20 = vpop.f32.mrb[10].mxu0 }
 0x431   : > { %v1777_v21 = vpop.f32.mrb[11].mxu0 }
 0x460   : > { %v1018_v27 = vpop.xlane.xlu1 %1017 }
 0x461   : > { %1969 = vrcp.f32 %v1018_v27 }
 0x462   : > { %1971 = vrcp.f32 %v900_v45 }
 0x46b   : > { %v1970_v39 = vpop.eup %1969 }
 0x46c   : > { %v1972_v46 = vpop.eup %1971 }
 0x46d   : > { %v949_v47 = vmul.f32 %v1972_v46, %v943_v18 }
 0x46f   : > { %v950_v50 = vpack.c.bf16 %v949_v47, %v949_v47 }
 0x4a3   : > { %v1065_v22 = vpop.f32.mrb[12].mxu0 }
 0x4a4   : > { %v1788_v23 = vpop.f32.mrb[13].mxu0  ;;  %v1071_v40 = vmul.f32 %v1970_v39, %v1065_v22 }
 0x4a5   : > { %v1068_v24 = vpop.f32.mrb[14].mxu0 }
 0x4a6   : > { %v1789_v25 = vpop.f32.mrb[15].mxu0  ;;  %v1072_v43 = vpack.c.bf16 %v1071_v40, %v1071_v40 }
 0x4ab   : > { %v1178_v26 = vpop.f32.mrb[16].mxu0 }
 0x4ac   : > { %v1179_v28 = vadd.f32 %v2739_v42, %v1178_v26  ;;  %v1800_v29 = vpop.f32.mrb[17].mxu0 }
 0x4ad   : > { %v1181_v30 = vpop.f32.mrb[18].mxu0 }
 0x4ae   : > { %v1801_v31 = vpop.f32.mrb[19].mxu0  ;;  %v1184_v32 = vsel %vm842_vm3, %v1179_v28, -inf }
 0x4af   : > { %1185 = vmax.xlane.f32.xlu1 %v1184_v32 }
 0x4b3   : > { %v1295_v33 = vpop.f32.mrb[20].mxu0 }
 0x4b4   : > { %v1296_v34 = vadd.f32 %v2739_v42, %v1295_v33  ;;  %v1812_v35 = vpop.f32.mrb[21].mxu0  ;;  %v1137_v42 = vld [vmem:[#allocation3 + $0x4] sm:$0xf] }
 0x4b5   : > { %v1298_v36 = vpop.f32.mrb[22].mxu0  ;;  %v1697_v44 = vcombine.low %v1137_v42, %v1137_v42  ;;  %v1201_v55 = vsel %vm905_vm4, %v1137_v42, 0 }
 0x4b6   : > { %v1813_v37 = vpop.f32.mrb[23].mxu0  ;;  %v1301_v38 = vsel %vm842_vm3, %v1296_v34, -inf  ;;  %v1427_v36 = vld [vmem:[%s2664_s21] sm:$0xff] }
 0x4b7   : > { %1302 = vmax.xlane.f32.xlu0 %v1301_v38 }
 0x4c0   : > { %1074 = vrot.lane.b32.xlu1 %v1072_v43, %s2296_s14 }
 0x4cd   : > { %1317 = vrot.lane.b32.xlu0 %v1697_v44, %s2295_s12  ;;  %s2926_s12 = sld [smem:[#allocation32_spill]] }
 0x4d3   : > { %v1703_v35 = vld [vmem:[%s2926_s12] ss:$0 sm:$0xff]  ;;  %s1470_s12 = scalar_lea.sflag [#allocation8], %s2650_s6 }
 0x53c   : > { %v1186_v48 = vpop.xlane.xlu1 %1185 }
 0x53d   : > { %v1187_v49 = vsub.f32 %v1179_v28, %v1186_v48 }
 0x53f   : > { %v1188_v51 = vpack.c.bf16 %v1187_v49, %v1187_v49 }
 0x540   : > { %v1075_v52 = vpop.permute.xlu1 %1074 }
 0x541   : > { %v1190_v53 = vmul.bf16 1069105081, %v1188_v51  ;;  %v1078_v54 = vsel %vm842_vm3, %v950_v50, %v1075_v52  ;;  %v1704_v50 = vld [vmem:[%s2927_s20] ss:$0 sm:$0xff] }
 0x542   : > { %1793 = vmatmul.mubr.msk.bf16.vlgmr.msra.gmra.mrb[12].mxu1 %vm1088_vm5, %v1078_v54  ;;  %v1705_v52 = vld [vmem:[%s2928_s28] ss:$0 sm:$0xff] }
 0x543   : > { %1973 = vpow.bf16 %v1190_v53  ;;  %1803 = vmatpush3.bf16.msra.mxu1 %v1201_v55  ;;  %1804 = vmatprep.mubr.msk.bf16.mxu1 %vm2293_vm1, %v2292_v0 }
 0x544   : > { %v1303_v56 = vpop.xlane.xlu0 %1302  ;;  %1814 = vmatprep.subr.bf16.mxu1 %v2292_v0 }
 0x545   : > { %v1304_v57 = vsub.f32 %v1296_v34, %v1303_v56 }
 0x547   : > { %v1305_v58 = vpack.c.bf16 %v1304_v57, %v1304_v57 }
 0x548   : > { %v1318_v60 = vpop.permute.xlu0 %1317 }
 0x549   : > { %v1307_v59 = vmul.bf16 1069105081, %v1305_v58  ;;  %v1323_v62 = vsel %vm905_vm4, %v1318_v60, 0 }
 0x54b   : > { %1975 = vpow.bf16 %v1307_v59 }
 0x54e   : > { %v1974_v61 = vpop.eup %1973 }
 0x54f   : > { %1805 = vmatmul.mubr.msk.bf16.vlgmr.msra.gmra.mrb[16].mxu1 %vm842_vm3, %v1974_v61  ;;  %v1192_v63 = vunpack.c.l.bf16 %v1974_v61 }
 0x550   : > { %1815 = vmatpush3.bf16.msra.mxu1 %v1323_v62  ;;  %1816 = vmatprep.mubr.msk.bf16.mxu1 %vm2293_vm1, %v2292_v0 }
 0x551   : > { %v1193_v1 = vsel %vm842_vm3, %v1192_v63, 0.0 }
 0x552   : > { %1194 = vadd.xlane.f32.xlu0 %v1193_v1 }
 0x556   : > { %v1976_v2 = vpop.eup %1975 }
 0x557   : > { %1817 = vmatmul.mubr.msk.bf16.vlgmr.msra.gmra.mrb[20].mxu1 %vm842_vm3, %v1976_v2  ;;  %v1309_v3 = vunpack.c.l.bf16 %v1976_v2 }
 0x559   : > { %v1310_v4 = vsel %vm842_vm3, %v1309_v3, 0.0 }
 0x55a   : > { %1311 = vadd.xlane.f32.xlu1 %v1310_v4 }
 0x5df   : > { %v1195_v23 = vpop.xlane.xlu0 %1194 }
 0x5e7   : > { %v1312_v11 = vpop.xlane.xlu1 %1311 }
 0x5e8   : > { %1977 = vrcp.f32 %v1312_v11 }
 0x5e9   : > { %1979 = vrcp.f32 %v1195_v23 }
 0x5f2   : > { %v1978_v16 = vpop.eup %1977 }
 0x5f3   : > { %v1980_v24 = vpop.eup %1979 }
 0x615   : > { %v1125_v7 = vpop.f32.mrb[12].mxu1 }
 0x616   : > { %v1131_v8 = vadd.f32 %v1125_v7, %v1079_v6  ;;  %v1794_v9 = vpop.f32.mrb[13].mxu1 }
 0x617   : > { %v1128_v0 = vpop.f32.mrb[14].mxu1 }
 0x618   : > { %1132 = vst.msk [vmem:[#allocation5] sm:$0xff] %vm620_vm0, %v1131_v8  ;;  %v1795_v10 = vpop.f32.mrb[15].mxu1 }
 0x61f   : > { %v1373_v29 = vld [vmem:[#allocation5] sm:$0xff] }
 0x622   : > { %v1237_v12 = vpop.f32.mrb[16].mxu1 }
 0x623   : > { %v1806_v13 = vpop.f32.mrb[17].mxu1  ;;  %v1243_v25 = vmul.f32 %v1980_v24, %v1237_v12 }
 0x624   : > { %v1240_v14 = vpop.f32.mrb[18].mxu1 }
 0x625   : > { %v1807_v15 = vpop.f32.mrb[19].mxu1  ;;  %v1244_v26 = vpack.c.bf16 %v1243_v25, %v1243_v25 }
 0x62a   : > { %v1359_v17 = vpop.f32.mrb[20].mxu1 }
 0x62b   : > { %v1365_v18 = vmul.f32 %v1978_v16, %v1359_v17  ;;  %v1818_v19 = vpop.f32.mrb[21].mxu1 }
 0x62c   : > { %v1362_v20 = vpop.f32.mrb[22].mxu1 }
 0x62d   : > { %v1366_v21 = vpack.c.bf16 %v1365_v18, %v1365_v18  ;;  %v1819_v22 = vpop.f32.mrb[23].mxu1 }
 0x62f   : > { %1368 = vrot.lane.b32.xlu1 %v1366_v21, %s2296_s14  ;;  %s1484_s14 = sshll.u32 %s586_s0, 4  ;;  %s2821_s14 = int_to_ptr.vmem [resolvable:$true] %s1484_s14 }
 0x630   : > { %s2183_s21 = scalar_lea.vmem %s2821_s14, 128  ;;  %p2190_p4 = scmp.lt.s32.totalorder %s2821_s14, %s2188_s2 }
 0x631   : > { %p2184_p0 = scmp.ne.s32.totalorder %s2821_s14, %s2183_s21  ;;  %p2191_p11 = scmp.lt.s32.totalorder %s2189_s23, %s2183_s21 }
 0x633   : > { %p2185_p5 = pnand %p2184_p0, %p2930_p7  ;;  %p2192_p6 = por %p2191_p11, %p2190_p4 }
 0x635   : > { %p2186_p2 = pneg %p2185_p5 }
 0x637   : > { %p2193_p10 = pnand %p2192_p6, %p2186_p2 }
 0x6a1   : > { %v1369_v27 = vpop.permute.xlu1 %1368 }
 0x6a2   : > { %v1372_v28 = vsel %vm842_vm3, %v1244_v26, %v1369_v27 }
 0x6a3   : > { %1823 = vmatmul.mubr.msk.bf16.vlgmr.msra.gmra.mrb[24].mxu0 %vm1088_vm5, %v1372_v28 }
 0x776   : > { %v1419_v30 = vpop.f32.mrb[24].mxu0 }
 0x777   : > { %v1425_v31 = vadd.f32 %v1419_v30, %v1373_v29  ;;  %v1824_v32 = vpop.f32.mrb[25].mxu0 }
 0x778   : > { %v1422_v33 = vpop.f32.mrb[26].mxu0 }
 0x779   : > { %1426 = vst.msk [vmem:[#allocation5] sm:$0xff] %vm620_vm0, %v1425_v31  ;;  %v1825_v34 = vpop.f32.mrb[27].mxu0 }
 0x780   : > { %v1428_v37 = vld [vmem:[#allocation5] sm:$0xff] }
 0x781   : > { %v1436_v38 = vadd.f32 %v1703_v35, %v1428_v37 }
 0x783   : > { %v1437_v39 = vadd.f32 %v1436_v38, %v1427_v36 }
 0x785   : > { %v1438_v40 = vsel %vm620_vm0, %v1437_v39, 0.0 }
 0x786   : > { %1439 = vadd.xlane.f32.xlu0 %v1438_v40 }
 0x813   : > { %v1440_v41 = vpop.xlane.xlu0 %1439 }
 0x814   : > { %v1442_v43 = vmul.f32 0.03125, %v1440_v41 }
 0x816   : > { %v1443_v42 = vsub.f32 %v1437_v39, %v1442_v43 }
 0x818   : > { %v1444_v44 = vmul.f32 %v1443_v42, %v1443_v42 }
 0x81a   : > { %v1445_v45 = vsel %vm620_vm0, %v1444_v44, 0.0 }
 0x81b   : > { %1446 = vadd.xlane.f32.xlu0 %v1445_v45 }
 0x8a8   : > { %v1447_v46 = vpop.xlane.xlu0 %1446 }
 0x8a9   : > { %v1448_v47 = vmul.f32 0.03125, %v1447_v46 }
 0x8ab   : > { %v1449_v48 = vadd.f32 1e-12, %v1448_v47 }
 0x8ad   : > { %1981 = vrsqrt.f32 %v1449_v48 }
 0x8b7   : > { %v1982_v49 = vpop.eup %1981 }
 0x8b8   : > { %v1451_v51 = vmul.f32 %v1982_v49, %v1443_v42 }
 0x8ba   : > { %v1459_v53 = vmul.f32 %v1704_v50, %v1451_v51 }
 0x8bc   : > { %v1467_v54 = vadd.f32 %v1705_v52, %v1459_v53 }
 0x8be   : > { %1468 = vst.msk [vmem:[%s586_s0] sm:$0xff] %vm620_vm0, %v1467_v54 }
 0x8bf   : > { %2196 = shalt.err (!%p2193_p10)
}
 0x8c0   : > { %s2197_s6 = scalar_lea.hbm %s2819_s19, 128  ;;  %s2201_s4 = scalar_lea.hbm %s2929_s17, 256 }
 0x8c1   : > { %p2198_p1 = scmp.ne.s32.totalorder %s2819_s19, %s2197_s6  ;;  %p2202_p3 = scmp.lt.u32.totalorder %s2819_s19, %s2929_s17 }
 0x8c2   : > { %p2203_p12 = scmp.lt.u32.totalorder %s2201_s4, %s2197_s6  ;;  %p2205_p0 = scmp.lt.u32.totalorder %s2197_s6, %s2819_s19 }
 0x8c3   : > { %p2199_p9 = pnand %p2198_p1, %p2930_p7 }
 0x8c4   : > { %p2204_p13 = por %p2203_p12, %p2202_p3 }
 0x8c5   : > { %p2200_p8 = pneg %p2199_p9 }
 0x8c6   : > { %p2206_p5 = por %p2205_p0, %p2204_p13 }
 0x8c8   : > { %p2207_p2 = pnand %p2206_p5, %p2200_p8 }
 0x8ca   : > { %2210 = shalt.err (!%p2207_p2)
}
 0x8cb   : > { %1850 = dma.vmem_to_hbm [thread:$0]  (%p2930_p7), %s2821_s14, 128, %s2819_s19, %s1470_s12  }
 0x8cc PF: > { %s1496_s0 = sand.u32 1, %s2261_s25   ;;  %p2931_p4 = scmp.ne.s32.totalorder %s2911_s24, 0 }
 0x8cd   : > { %p2932_p11 = scmp.ge.s32.totalorder %s2281_s30, 2  ;;  %s1497_s16 = scalar_lea.sflag [#allocation8], %s1496_s0 }
 0x8cf   : > { %p1876_p6 = pnand %p2932_p11, %p2931_p4 }
 0x8d1   : > { %2256 = dma.done.wait (!%p1876_p6), %s1497_s16, 128  }
 0x8d2   : > { %2258 = vsyncadd (!%p1876_p6), %s1497_s16, 4294967168  ;;  %s34_s30 = sadd.s32 1, %s2281_s30   ;;  %s2933_s25 = smov %s2265_s26 }
 0x8d3   : > { %p31_p10 = scmp.ge.s32.totalorder %s34_s30, 4   ;;  %s2934_s26 = smov %s2269_s27 }
 0x8d4   : > { %s2935_s27 = smov %s2566_s10  ;;  %s2936_s28 = smov %s2277_s29 }
 0x8d5   : > { %s2937_s29 = smov %s2939_s13  ;;  %33 = sbr.rel (!%p31_p10) target bundleno = 21 (0x15), region = 164 }
 0x8dc   :  { %1502 = vsyncpa [#allocation7], 1 }
 0x8dd   :  { %1504 = vsyncpa [#allocation7 + $0x1], 1 }
 0x8de   :  { %1505 = vsyncpa [#allocation10], 1 }
 0x8df   :  { %1507 = vsyncpa [#allocation10 + $0x1], 1 }
 0x8e0   :  { %1508 = vsyncpa [#allocation13], 1 }
 0x8e1   :  { %1509 = vsyncpa [#allocation16], 1 }
 0x8e2   :  { %1510 = vsyncpa [#allocation8], 1 }
 0x8e3   :  { %1512 = vsyncpa [#allocation8 + $0x1], 1 }

</bundles_post_ra>
